<compile_context>
chip_gen: v7x
topology: tpu7x:2x2x1
jax: 0.10.0
libtpu: 0.0.40
codegen_flags: <defaults>
</compile_context>

<pallas_src>
import math
import jax
import jax.numpy as jnp
from jax.experimental import pallas as pl
from jax.experimental.pallas import tpu as pltpu


def _round_up(x, m):
    return ((x + m - 1) // m) * m


# ----------------------------------------------------------------------------
# Kernel
# ----------------------------------------------------------------------------
def critic_kernel(x_ref,
                  w1_ref, b1_ref,
                  w3_ref, b3_ref,
                  w7_ref, b7_ref,
                  w48_ref, b48_ref,
                  q_ref):
    f32 = jnp.float32
    bf16 = jnp.bfloat16

    # Fused first stage for BOTH Q streams (single K=36 MXU pass):
    #   [a1 | b1 | a2 | b2] = relu(x @ W_first + b_first)
    acts = jnp.dot(x_ref[...], w1_ref[...], preferred_element_type=f32) + b1_ref[...]
    acts = jnp.maximum(acts, 0.0).astype(bf16)                # (TB, 1024) bf16

    psa1 = acts[:, :512]                                      # [a1 | b1] lane-aligned
    psa2 = acts[:, 512:]                                      # [a2 | b2]

    h1 = jnp.dot(psa1, w3_ref[...], preferred_element_type=f32) + b3_ref[...]
    h1 = jnp.maximum(h1, 0.0).astype(bf16)                    # (TB, 512) bf16
    h2 = jnp.dot(psa2, w7_ref[...], preferred_element_type=f32) + b7_ref[...]
    h2 = jnp.maximum(h2, 0.0).astype(bf16)                    # (TB, 512) bf16

    # Final layer: W48 is (1024, 2) block-diagonal [[w4, 0], [0, w8]]; applied
    # as two row-block matmuls -> single lane-packed (TB, 2) output, no concat.
    w48 = w48_ref[...]
    q = (jnp.dot(h1, w48[:512, :], preferred_element_type=f32)
         + jnp.dot(h2, w48[512:, :], preferred_element_type=f32)
         + b48_ref[...])
    q_ref[...] = q                                            # (TB, 2) = [q1 | q2]


# ----------------------------------------------------------------------------
# Wrapper
# ----------------------------------------------------------------------------
def critic_forward(previous_state, state, action, packed, *, tile_b=None):
    """Pallas implementation of Critic.forward -> (q1, q2)."""
    B = previous_state.shape[0]

    # Pre-concatenate + pre-cast inputs once (bf16 is what the kernel consumes
    # anyway); this is the single activation input of the fused first stage.
    x = jnp.concatenate([previous_state, state, action], axis=1).astype(jnp.bfloat16)
    in_dim = x.shape[1]

    if tile_b is None:
        if B <= 256:
            tile_b = _round_up(B, 8)                 # single small block
        elif B <= 1024:
            tile_b = _round_up((B + 1) // 2, 8)      # >= 2 grid steps (v7x megacore)
        else:
            tile_b = 512                             # amortize ~0.35us/step overhead
    tile_b = max(8, _round_up(tile_b, 8))

    # No whole-batch fallback: pad the batch to a multiple of the tile so the
    # per-step footprint stays bounded and pipelining is preserved.
    B_pad = _round_up(B, tile_b)
    if B_pad != B:
        x = jnp.pad(x, ((0, B_pad - B), (0, 0)))
    grid = (B_pad // tile_b,)

    def resident_spec(arr):
        # Full-array block, same block index every grid step -> stays in VMEM.
        return pl.BlockSpec(arr.shape, lambda i: (0, 0))

    weight_names = ("w_first", "b_first", "w3", "b3", "w7", "b7", "w48", "b48")
    weights = [packed[n] for n in weight_names]
    weight_bytes = sum(int(w.size) * w.dtype.itemsize for w in weights)

    cost = pl.CostEstimate(
        flops=2 * B_pad * (in_dim * 1024 + 2 * 512 * 512 + 1024 * 2),
        transcendentals=0,
        bytes_accessed=int(x.size) * 2 + weight_bytes + B_pad * 2 * 4,
    )

    q12 = pl.pallas_call(
        critic_kernel,
        out_shape=jax.ShapeDtypeStruct((B_pad, 2), jnp.float32),
        grid_spec=pltpu.PrefetchScalarGridSpec(
            num_scalar_prefetch=0,
            grid=grid,
            in_specs=[pl.BlockSpec((tile_b, in_dim), lambda i: (i, 0))]
                     + [resident_spec(w) for w in weights],
            out_specs=pl.BlockSpec((tile_b, 2), lambda i: (i, 0)),
        ),
        compiler_params=pltpu.CompilerParams(
            dimension_semantics=("parallel",)),       # megacore sharding on v7x
        cost_estimate=cost,
    )(x, *weights)

    q12 = q12[:B]
    return q12[:, 0:1], q12[:, 1:2]


# ----------------------------------------------------------------------------
# Parameter init (PyTorch-like) and one-time packing into kernel layout
# ----------------------------------------------------------------------------
def init_params(key, state_dim, action_dim, n_step):
    """Deterministic init mirroring nn.Linear shapes (stored transposed: (in, out))."""
    prev_dim = n_step * math.ceil(state_dim / n_step)
    sa_dim = state_dim + action_dim
    layer_dims = {
        "l1": (prev_dim, 128), "l2": (sa_dim, 384), "l3": (512, 512), "l4": (512, 1),
        "l5": (prev_dim, 128), "l6": (sa_dim, 384), "l7": (512, 512), "l8": (512, 1),
    }
    params = {}
    for name, (fan_in, fan_out) in layer_dims.items():
        key, kw, kb = jax.random.split(key, 3)
        bound = 1.0 / math.sqrt(fan_in)
        w = jax.random.uniform(kw, (fan_in, fan_out), jnp.float32, -bound, bound)
        b = jax.random.uniform(kb, (1, fan_out), jnp.float32, -bound, bound)
        params[name] = (w, b)
    return params


def pack_params(params, state_dim, action_dim):
    """Pack per-layer weights into the fused block-diagonal bf16 layout (done once)."""
    f32, bf16 = jnp.float32, jnp.bfloat16
    (w1, b1), (w2, b2), (w3, b3), (w4, b4) = (params[k] for k in ("l1", "l2", "l3", "l4"))
    (w5, b5), (w6, b6), (w7, b7), (w8, b8) = (params[k] for k in ("l5", "l6", "l7", "l8"))
    prev_dim = w1.shape[0]

    # Fused first-stage weight, row blocks ordered [prev | state | action] to
    # match the wrapper-side input concat.  Output column layout:
    # [a1 (128) | b1 (384) | a2 (128) | b2 (384)].  Zero blocks are exact.
    z_p = jnp.zeros((prev_dim, 384), f32)
    w_prev = jnp.concatenate([w1, z_p, w5, z_p], axis=1)                            # (prev_dim, 1024)
    z_s = jnp.zeros((state_dim, 128), f32)
    w_state = jnp.concatenate([z_s, w2[:state_dim], z_s, w6[:state_dim]], axis=1)   # (state_dim, 1024)
    z_a = jnp.zeros((action_dim, 128), f32)
    w_action = jnp.concatenate([z_a, w2[state_dim:], z_a, w6[state_dim:]], axis=1)  # (action_dim, 1024)
    w_first = jnp.concatenate([w_prev, w_state, w_action], axis=0)                  # (in_dim, 1024)
    b_first = jnp.concatenate([b1, b2, b5, b6], axis=1)                             # (1, 1024)

    # Final-stage packed weight: (1024, 2) block-diagonal [[w4, 0], [0, w8]].
    w48 = jnp.zeros((1024, 2), f32)
    w48 = w48.at[:512, 0:1].set(w4).at[512:, 1:2].set(w8)
    b48 = jnp.concatenate([b4, b8], axis=1)                                         # (1, 2)

    return dict(
        w_first=w_first.astype(bf16), b_first=b_first.astype(f32),
        w3=w3.astype(bf16), b3=b3.astype(f32),
        w7=w7.astype(bf16), b7=b7.astype(f32),
        w48=w48.astype(bf16), b48=b48.astype(f32),
    )


# ----------------------------------------------------------------------------
# References
# ----------------------------------------------------------------------------
def critic_forward_ref_f32(previous_state, state, action, params):
    """True f32 reference (mirrors the PyTorch module exactly)."""
    sa = jnp.concatenate([state, action], axis=1)

    def lin(x, layer):
        w, b = params[layer]
        return x @ w + b

    a1 = jax.nn.relu(lin(previous_state, "l1"))
    b1 = jax.nn.relu(lin(sa, "l2"))
    q1 = lin(jax.nn.relu(lin(jnp.concatenate([a1, b1], 1), "l3")), "l4")
    a2 = jax.nn.relu(lin(previous_state, "l5"))
    b2 = jax.nn.relu(lin(sa, "l6"))
    q2 = lin(jax.nn.relu(lin(jnp.concatenate([a2, b2], 1), "l7")), "l8")
    return q1, q2


def critic_forward_ref_quant(previous_state, state, action, packed):
    """Reference applying the same bf16 rounding as the kernel, in plain JAX."""
    f32, bf16 = jnp.float32, jnp.bfloat16

    def q(v):
        return v.astype(bf16).astype(f32)

    x = q(jnp.concatenate([previous_state, state, action], axis=1))
    acts = jnp.maximum(x @ packed["w_first"].astype(f32) + packed["b_first"], 0.0)
    acts = q(acts)
    h1 = q(jnp.maximum(acts[:, :512] @ packed["w3"].astype(f32) + packed["b3"], 0.0))
    h2 = q(jnp.maximum(acts[:, 512:] @ packed["w7"].astype(f32) + packed["b7"], 0.0))
    w48 = packed["w48"].astype(f32)
    qout = h1 @ w48[:512, :] + h2 @ w48[512:, :] + packed["b48"]
    return qout[:, 0:1], qout[:, 1:2]


# ----------------------------------------------------------------------------
# Main
# ----------------------------------------------------------------------------
if __name__ == "__main__":
    # small, forward-consistent shapes
    batch = 2
    state_dim = 16
    action_dim = 4
    n_step = 8
    prev_dim = n_step * math.ceil(state_dim / n_step)   # 16

    key = jax.random.PRNGKey(0)
    key, k_prev, k_state, k_act, k_params = jax.random.split(key, 5)
    previous_state = jax.random.normal(k_prev, (batch, prev_dim), jnp.float32)
    state = jax.random.normal(k_state, (batch, state_dim), jnp.float32)
    action = jax.random.normal(k_act, (batch, action_dim), jnp.float32)

    params = init_params(k_params, state_dim, action_dim, n_step)
    packed = pack_params(params, state_dim, action_dim)

    q1, q2 = critic_forward(previous_state, state, action, packed)
    jax.block_until_ready((q1, q2))
    assert q1.shape == (batch, 1) and q2.shape == (batch, 1)

    # Tight check against a reference using identical bf16 quantization.
    q1_q, q2_q = critic_forward_ref_quant(previous_state, state, action, packed)
    assert jnp.allclose(q1, q1_q, atol=1e-3, rtol=1e-3)
    assert jnp.allclose(q2, q2_q, atol=1e-3, rtol=1e-3)

    # Loose check against the true f32 module semantics (bf16 weights are a
    # deliberate precision trade-off per the performance review).
    q1_f, q2_f = critic_forward_ref_f32(previous_state, state, action, params)
    assert jnp.allclose(q1, q1_f, atol=2e-2, rtol=2e-2)
    assert jnp.allclose(q2, q2_f, atol=2e-2, rtol=2e-2)

    # Exercise the new padded / multi-step grid path (B=260 -> 2 grid steps,
    # batch padded to a multiple of the tile, weights VMEM-resident across steps).
    key, k2p, k2s, k2a = jax.random.split(key, 4)
    B2 = 260
    prev2 = jax.random.normal(k2p, (B2, prev_dim), jnp.float32)
    state2 = jax.random.normal(k2s, (B2, state_dim), jnp.float32)
    act2 = jax.random.normal(k2a, (B2, action_dim), jnp.float32)
    q1b, q2b = critic_forward(prev2, state2, act2, packed)
    jax.block_until_ready((q1b, q2b))
    assert q1b.shape == (B2, 1) and q2b.shape == (B2, 1)
    q1b_q, q2b_q = critic_forward_ref_quant(prev2, state2, act2, packed)
    assert jnp.allclose(q1b, q1b_q, atol=1e-3, rtol=1e-3)
    assert jnp.allclose(q2b, q2b_q, atol=1e-3, rtol=1e-3)

    print("KERNEL_OK")
</pallas_src>

<mosaic_0001>
module attributes {stable_mosaic.version = 11 : i64} {
  func.func @critic_kernel(%arg0: i32, %arg1: memref<8x36xbf16, #tpu.memory_space<vmem>>, %arg2: memref<36x1024xbf16, #tpu.memory_space<vmem>>, %arg3: memref<1x1024xf32, #tpu.memory_space<vmem>>, %arg4: memref<512x512xbf16, #tpu.memory_space<vmem>>, %arg5: memref<1x512xf32, #tpu.memory_space<vmem>>, %arg6: memref<512x512xbf16, #tpu.memory_space<vmem>>, %arg7: memref<1x512xf32, #tpu.memory_space<vmem>>, %arg8: memref<1024x2xbf16, #tpu.memory_space<vmem>>, %arg9: memref<1x2xf32, #tpu.memory_space<vmem>>, %arg10: memref<8x2xf32, #tpu.memory_space<vmem>>) attributes {dimension_semantics = [#tpu.dimension_semantics<parallel>], iteration_bounds = array<i64: 1>, scalar_prefetch = 0 : i64, scratch_operands = 0 : i64, tpu.core_type = #tpu.core_type<tc>, window_params = [{transform_indices = @transform_0, window_bounds = array<i64: 8, 36>}, {pipeline_mode = #tpu.pipeline_mode<synchronous>, transform_indices = @transform_1, window_bounds = array<i64: 36, 1024>}, {pipeline_mode = #tpu.pipeline_mode<synchronous>, transform_indices = @transform_2, window_bounds = array<i64: 1, 1024>}, {pipeline_mode = #tpu.pipeline_mode<synchronous>, transform_indices = @transform_3, window_bounds = array<i64: 512, 512>}, {pipeline_mode = #tpu.pipeline_mode<synchronous>, transform_indices = @transform_4, window_bounds = array<i64: 1, 512>}, {pipeline_mode = #tpu.pipeline_mode<synchronous>, transform_indices = @transform_5, window_bounds = array<i64: 512, 512>}, {pipeline_mode = #tpu.pipeline_mode<synchronous>, transform_indices = @transform_6, window_bounds = array<i64: 1, 512>}, {pipeline_mode = #tpu.pipeline_mode<synchronous>, transform_indices = @transform_7, window_bounds = array<i64: 1024, 2>}, {pipeline_mode = #tpu.pipeline_mode<synchronous>, transform_indices = @transform_8, window_bounds = array<i64: 1, 2>}, {transform_indices = @transform_9, window_bounds = array<i64: 8, 2>}]} {
    %c0 = arith.constant 0 : index
    %c0_0 = arith.constant 0 : index
    %0 = vector.load %arg1[%c0, %c0_0] : memref<8x36xbf16, #tpu.memory_space<vmem>>, vector<8x36xbf16>
    %c0_1 = arith.constant 0 : index
    %c0_2 = arith.constant 0 : index
    %1 = vector.load %arg2[%c0_1, %c0_2] : memref<36x1024xbf16, #tpu.memory_space<vmem>>, vector<36x1024xbf16>
    %cst = arith.constant dense<0.000000e+00> : vector<8x1024xf32>
    %2 = tpu.matmul %0, %1, %cst {dimension_numbers = #tpu.dot_dimension_numbers<[1], [0], [0], [1], [0, 0, 1, 1], [], []>} : vector<8x36xbf16>, vector<36x1024xbf16>, vector<8x1024xf32> -> vector<8x1024xf32>
    %c0_3 = arith.constant 0 : index
    %c0_4 = arith.constant 0 : index
    %3 = vector.load %arg3[%c0_3, %c0_4] : memref<1x1024xf32, #tpu.memory_space<vmem>>, vector<1x1024xf32>
    %4 = vector.broadcast %3 : vector<1x1024xf32> to vector<8x1024xf32>
    %5 = arith.addf %2, %4 : vector<8x1024xf32>
    %cst_5 = arith.constant 0.000000e+00 : f32
    %6 = vector.broadcast %cst_5 : f32 to vector<8x1024xf32>
    %7 = arith.maximumf %5, %6 : vector<8x1024xf32>
    %8 = arith.truncf %7 : vector<8x1024xf32> to vector<8x1024xbf16>
    %9 = vector.extract_strided_slice %8 {offsets = [0, 0], sizes = [8, 512], strides = [1, 1]} : vector<8x1024xbf16> to vector<8x512xbf16>
    %10 = vector.extract_strided_slice %8 {offsets = [0, 512], sizes = [8, 512], strides = [1, 1]} : vector<8x1024xbf16> to vector<8x512xbf16>
    %c0_6 = arith.constant 0 : index
    %c0_7 = arith.constant 0 : index
    %11 = vector.load %arg4[%c0_6, %c0_7] : memref<512x512xbf16, #tpu.memory_space<vmem>>, vector<512x512xbf16>
    %cst_8 = arith.constant dense<0.000000e+00> : vector<8x512xf32>
    %12 = tpu.matmul %9, %11, %cst_8 {dimension_numbers = #tpu.dot_dimension_numbers<[1], [0], [0], [1], [0, 0, 1, 1], [], []>} : vector<8x512xbf16>, vector<512x512xbf16>, vector<8x512xf32> -> vector<8x512xf32>
    %c0_9 = arith.constant 0 : index
    %c0_10 = arith.constant 0 : index
    %13 = vector.load %arg5[%c0_9, %c0_10] : memref<1x512xf32, #tpu.memory_space<vmem>>, vector<1x512xf32>
    %14 = vector.broadcast %13 : vector<1x512xf32> to vector<8x512xf32>
    %15 = arith.addf %12, %14 : vector<8x512xf32>
    %cst_11 = arith.constant 0.000000e+00 : f32
    %16 = vector.broadcast %cst_11 : f32 to vector<8x512xf32>
    %17 = arith.maximumf %15, %16 : vector<8x512xf32>
    %18 = arith.truncf %17 : vector<8x512xf32> to vector<8x512xbf16>
    %c0_12 = arith.constant 0 : index
    %c0_13 = arith.constant 0 : index
    %19 = vector.load %arg6[%c0_12, %c0_13] : memref<512x512xbf16, #tpu.memory_space<vmem>>, vector<512x512xbf16>
    %cst_14 = arith.constant dense<0.000000e+00> : vector<8x512xf32>
    %20 = tpu.matmul %10, %19, %cst_14 {dimension_numbers = #tpu.dot_dimension_numbers<[1], [0], [0], [1], [0, 0, 1, 1], [], []>} : vector<8x512xbf16>, vector<512x512xbf16>, vector<8x512xf32> -> vector<8x512xf32>
    %c0_15 = arith.constant 0 : index
    %c0_16 = arith.constant 0 : index
    %21 = vector.load %arg7[%c0_15, %c0_16] : memref<1x512xf32, #tpu.memory_space<vmem>>, vector<1x512xf32>
    %22 = vector.broadcast %21 : vector<1x512xf32> to vector<8x512xf32>
    %23 = arith.addf %20, %22 : vector<8x512xf32>
    %cst_17 = arith.constant 0.000000e+00 : f32
    %24 = vector.broadcast %cst_17 : f32 to vector<8x512xf32>
    %25 = arith.maximumf %23, %24 : vector<8x512xf32>
    %26 = arith.truncf %25 : vector<8x512xf32> to vector<8x512xbf16>
    %c0_18 = arith.constant 0 : index
    %c0_19 = arith.constant 0 : index
    %27 = vector.load %arg8[%c0_18, %c0_19] : memref<1024x2xbf16, #tpu.memory_space<vmem>>, vector<1024x2xbf16>
    %28 = vector.extract_strided_slice %27 {offsets = [0, 0], sizes = [512, 2], strides = [1, 1]} : vector<1024x2xbf16> to vector<512x2xbf16>
    %cst_20 = arith.constant dense<0.000000e+00> : vector<8x2xf32>
    %29 = tpu.matmul %18, %28, %cst_20 {dimension_numbers = #tpu.dot_dimension_numbers<[1], [0], [0], [1], [0, 0, 1, 1], [], []>} : vector<8x512xbf16>, vector<512x2xbf16>, vector<8x2xf32> -> vector<8x2xf32>
    %30 = vector.extract_strided_slice %27 {offsets = [512, 0], sizes = [512, 2], strides = [1, 1]} : vector<1024x2xbf16> to vector<512x2xbf16>
    %cst_21 = arith.constant dense<0.000000e+00> : vector<8x2xf32>
    %31 = tpu.matmul %26, %30, %cst_21 {dimension_numbers = #tpu.dot_dimension_numbers<[1], [0], [0], [1], [0, 0, 1, 1], [], []>} : vector<8x512xbf16>, vector<512x2xbf16>, vector<8x2xf32> -> vector<8x2xf32>
    %32 = arith.addf %29, %31 : vector<8x2xf32>
    %c0_22 = arith.constant 0 : index
    %c0_23 = arith.constant 0 : index
    %33 = vector.load %arg9[%c0_22, %c0_23] : memref<1x2xf32, #tpu.memory_space<vmem>>, vector<1x2xf32>
    %34 = vector.broadcast %33 : vector<1x2xf32> to vector<8x2xf32>
    %35 = arith.addf %32, %34 : vector<8x2xf32>
    %c0_24 = arith.constant 0 : index
    %c0_25 = arith.constant 0 : index
    %36 = vector.load %arg10[%c0_24, %c0_25] : memref<8x2xf32, #tpu.memory_space<vmem>>, vector<8x2xf32>
    tpu.vector_store %arg10[%c0_24, %c0_25], %35 {strides = array<i32>} : memref<8x2xf32, #tpu.memory_space<vmem>>, vector<8x2xf32>,
    return
  }
  func.func @transform_0(%arg0: i32) -> (i32, i32) {
    %c0_i32 = arith.constant 0 : i32
    %c0_i32_0 = arith.constant 0 : i32
    return %arg0, %c0_i32 : i32, i32
  }
  func.func @transform_1(%arg0: i32) -> (i32, i32) {
    %c0_i32 = arith.constant 0 : i32
    %c0_i32_0 = arith.constant 0 : i32
    %c0_i32_1 = arith.constant 0 : i32
    return %c0_i32, %c0_i32_0 : i32, i32
  }
  func.func @transform_2(%arg0: i32) -> (i32, i32) {
    %c0_i32 = arith.constant 0 : i32
    %c0_i32_0 = arith.constant 0 : i32
    %c0_i32_1 = arith.constant 0 : i32
    return %c0_i32, %c0_i32_0 : i32, i32
  }
  func.func @transform_3(%arg0: i32) -> (i32, i32) {
    %c0_i32 = arith.constant 0 : i32
    %c0_i32_0 = arith.constant 0 : i32
    %c0_i32_1 = arith.constant 0 : i32
    return %c0_i32, %c0_i32_0 : i32, i32
  }
  func.func @transform_4(%arg0: i32) -> (i32, i32) {
    %c0_i32 = arith.constant 0 : i32
    %c0_i32_0 = arith.constant 0 : i32
    %c0_i32_1 = arith.constant 0 : i32
    return %c0_i32, %c0_i32_0 : i32, i32
  }
  func.func @transform_5(%arg0: i32) -> (i32, i32) {
    %c0_i32 = arith.constant 0 : i32
    %c0_i32_0 = arith.constant 0 : i32
    %c0_i32_1 = arith.constant 0 : i32
    return %c0_i32, %c0_i32_0 : i32, i32
  }
  func.func @transform_6(%arg0: i32) -> (i32, i32) {
    %c0_i32 = arith.constant 0 : i32
    %c0_i32_0 = arith.constant 0 : i32
    %c0_i32_1 = arith.constant 0 : i32
    return %c0_i32, %c0_i32_0 : i32, i32
  }
  func.func @transform_7(%arg0: i32) -> (i32, i32) {
    %c0_i32 = arith.constant 0 : i32
    %c0_i32_0 = arith.constant 0 : i32
    %c0_i32_1 = arith.constant 0 : i32
    return %c0_i32, %c0_i32_0 : i32, i32
  }
  func.func @transform_8(%arg0: i32) -> (i32, i32) {
    %c0_i32 = arith.constant 0 : i32
    %c0_i32_0 = arith.constant 0 : i32
    %c0_i32_1 = arith.constant 0 : i32
    return %c0_i32, %c0_i32_0 : i32, i32
  }
  func.func @transform_9(%arg0: i32) -> (i32, i32) {
    %c0_i32 = arith.constant 0 : i32
    %c0_i32_0 = arith.constant 0 : i32
    return %arg0, %c0_i32 : i32, i32
  }
}

</mosaic_0001>

<bundles_post_ra>
// kernel: tpu_custom_call.1
= control target key start
LH: loop header
LB: loop body
LE: loop exit
PB: predicated region body
PF: predicated region fallthrough
CT: control target
= control target key end

     0   :  { %14 = vsyncpa [#allocation3], 0  ;;  %s4451_s0 = inlined_call_operand.vmem [shape: bf16[8,36], index: 0, kind: input, shape index: {}]   ;;  %s4452_s1 = inlined_call_operand.vmem [shape: bf16[36,1024], index: 1, kind: input, shape index: {}]   ;;  %s4453_s2 = inlined_call_operand.vmem [shape: f32[1,1024], index: 2, kind: input, shape index: {}]   ;;  %s4454_s3 = inlined_call_operand.hbm [shape: bf16[512,512], index: 3, kind: input, shape index: {}]   ;;  %s4455_s4 = inlined_call_operand.vmem [shape: f32[1,512], index: 4, kind: input, shape index: {}]   ;;  %s4456_s5 = inlined_call_operand.hbm [shape: bf16[512,512], index: 5, kind: input, shape index: {}]   ;;  %s4457_s6 = inlined_call_operand.vmem [shape: f32[1,512], index: 6, kind: input, shape index: {}]   ;;  %s4458_s7 = inlined_call_operand.vmem [shape: bf16[1024,2], index: 7, kind: input, shape index: {}]   ;;  %s4459_s8 = inlined_call_operand.vmem [shape: f32[1,2], index: 8, kind: input, shape index: {}]   ;;  %s4460_s9 = inlined_call_operand.vmem [shape: f32[8,2], index: 9, kind: output, shape index: {}]  }
   0x1   :  { %15 = vsyncpa [#allocation5], 0  ;;  %s4019_s30 = smov [#allocation2]   ;;  %s3971_s13 = scalar_lea.hbm %s4454_s3, 16384 }
   0x2   :  { %s27_s10 = sshll.u32 %s4019_s30, 4  ;;  %p3972_p0 = scmp.ne.s32.totalorder %s4454_s3, %s3971_s13  ;;  %s28_s10 = int_to_ptr.vmem [resolvable:$true] %s27_s10 }
   0x3   :  { %p3975_p1 = scmp.lt.u32.totalorder %s3971_s13, %s4454_s3 }
   0x5   :  { %p3977_p2 = pnand %p3975_p1, %p3972_p0 }
   0x7   :  { %3980 = shalt.err (!%p3977_p2)
}
   0x8   :  { %s3981_s18 = scalar_lea.vmem %s28_s10, 16384  ;;  %p3986_p4 = scmp.lt.s32.totalorder %s28_s10, %s28_s10 }
   0x9   :  { %p3982_p3 = scmp.ne.s32.totalorder %s28_s10, %s3981_s18  ;;  %p3987_p5 = scmp.lt.s32.totalorder %s3981_s18, %s3981_s18 }
   0xb   :  { %p3988_p6 = por %p3987_p5, %p3986_p4 }
   0xd   :  { %p3989_p7 = pnand %p3988_p6, %p3982_p3 }
   0xf   :  { %3992 = shalt.err (!%p3989_p7)
}
  0x10   :  { %s4020_s19 = smov 256   ;;  %s4021_s20 = smov 16  }
  0x11   :  { %33 = dma.hbm_to_vmem [thread:$0]  %s4454_s3, 16384, %s28_s10, [#allocation3], %s4020_s19, %s4020_s19, %s4021_s20  }
  0x12   :  { %s4022_s23 = smov [#allocation4]   ;;  %s3993_s27 = scalar_lea.hbm %s4456_s5, 16384 }
  0x13   :  { %s41_s24 = sshll.u32 %s4022_s23, 4  ;;  %p3994_p8 = scmp.ne.s32.totalorder %s4456_s5, %s3993_s27  ;;  %s42_s24 = int_to_ptr.vmem [resolvable:$true] %s41_s24 }
  0x14   :  { %p3997_p9 = scmp.lt.u32.totalorder %s3993_s27, %s4456_s5 }
  0x16   :  { %p3999_p10 = pnand %p3997_p9, %p3994_p8 }
  0x18   :  { %4002 = shalt.err (!%p3999_p10)
}
  0x19   :  { %s4003_s12 = scalar_lea.vmem %s42_s24, 16384  ;;  %p4008_p12 = scmp.lt.s32.totalorder %s42_s24, %s42_s24 }
  0x1a   :  { %p4004_p11 = scmp.ne.s32.totalorder %s42_s24, %s4003_s12  ;;  %p4009_p13 = scmp.lt.s32.totalorder %s4003_s12, %s4003_s12 }
  0x1c   :  { %p4010_p0 = por %p4009_p13, %p4008_p12 }
  0x1e   :  { %p4011_p1 = pnand %p4010_p0, %p4004_p11 }
  0x20   :  { %4014 = shalt.err (!%p4011_p1)
}
  0x21   :  { %47 = dma.hbm_to_vmem [thread:$0]  %s4456_s5, 16384, %s42_s24, [#allocation5], %s4020_s19, %s4020_s19, %s4021_s20  }
  0x22   :  { %4015 = dma.done.wait [#allocation3], 16384  }
  0x23   :  { %4016 = vsyncadd [#allocation3], 4294950912 }
  0x24   :  { %4017 = dma.done.wait [#allocation5], 16384  }
  0x25   :  { %4018 = vsyncadd [#allocation5], 4294950912  ;;  %v4023_v0 = vmov 0   ;;  %v62_v1 = vld [vmem:[%s4452_s1] sm:$0xff]  ;;  %v63_v9 = vld [vmem:[%s4452_s1 + $0x8] sm:$0xff]  ;;  %vm228_vm0 = vcmask 1041408  }
  0x26   :  { %285 = vmatprep.mubr.bf16.mxu0 %v4023_v0  ;;  %326 = vmatprep.mubr.bf16.mxu1 %v4023_v0  ;;  %v66_v2 = vld [vmem:[%s4452_s1 + $0x20] sm:$0xff]  ;;  %v67_v10 = vld [vmem:[%s4452_s1 + $0x28] sm:$0xff]  ;;  %v64_v21 = vld [vmem:[%s4452_s1 + $0x10] sm:$0xff]  ;;  %vm224_vm1 = vcmask 293888   ;;  %vm3037_vm2 = vcmask 15360  }
  0x27   :  { %v70_v3 = vld [vmem:[%s4452_s1 + $0x40] sm:$0xff]  ;;  %v3046_v4 = vcombine.high %v62_v1, %v66_v2  ;;  %v3045_v5 = vcombine.low %v62_v1, %v66_v2  ;;  %v71_v11 = vld [vmem:[%s4452_s1 + $0x48] sm:$0xff]  ;;  %v3048_v12 = vcombine.high %v63_v9, %v67_v10  ;;  %v3047_v13 = vcombine.low %v63_v9, %v67_v10  ;;  %v68_v22 = vld [vmem:[%s4452_s1 + $0x30] sm:$0xff] }
  0x28   :  { %v74_v6 = vld [vmem:[%s4452_s1 + $0x60] sm:$0xff]  ;;  %v75_v14 = vld [vmem:[%s4452_s1 + $0x68] sm:$0xff]  ;;  %v65_v25 = vld [vmem:[%s4452_s1 + $0x18] sm:$0xff]  ;;  %v3050_v28 = vcombine.high %v64_v21, %v68_v22  ;;  %v3049_v35 = vcombine.low %v64_v21, %v68_v22 }
  0x29   :  { %v78_v7 = vld [vmem:[%s4452_s1 + $0x80] sm:$0x33]  ;;  %v3054_v8 = vcombine.high %v70_v3, %v74_v6  ;;  %253 = vmatprep.subr.bf16.mxu0 %v3046_v4  ;;  %v3053_v15 = vcombine.low %v70_v3, %v74_v6  ;;  %v3056_v16 = vcombine.high %v71_v11, %v75_v14  ;;  %v79_v17 = vld [vmem:[%s4452_s1 + $0x88] sm:$0x33]  ;;  %294 = vmatprep.subr.bf16.mxu1 %v3048_v12  ;;  %v69_v26 = vld [vmem:[%s4452_s1 + $0x38] sm:$0xff] }
  0x2a   :  { %254 = vmatpush1.bf16.msra.mxu0 %v3045_v5  ;;  %v3062_v18 = vcombine.high %v78_v7, %v78_v7  ;;  %v3061_v19 = vcombine.low %v78_v7, %v78_v7  ;;  %295 = vmatpush1.bf16.msra.mxu1 %v3047_v13  ;;  %v3055_v20 = vcombine.low %v71_v11, %v75_v14  ;;  %v61_v29 = vld [vmem:[%s4451_s0] sm:$0xf]  ;;  %v72_v30 = vld [vmem:[%s4452_s1 + $0x50] sm:$0xff]  ;;  %v73_v34 = vld [vmem:[%s4452_s1 + $0x58] sm:$0xff] }
  0x2b   :  { %255 = vmatprep.subr.bf16.mxu0 %v3054_v8  ;;  %296 = vmatprep.subr.bf16.mxu1 %v3056_v16  ;;  %v3064_v23 = vcombine.high %v79_v17, %v79_v17  ;;  %v3063_v24 = vcombine.low %v79_v17, %v79_v17  ;;  %v76_v31 = vld [vmem:[%s4452_s1 + $0x70] sm:$0xff]  ;;  %v3052_v33 = vcombine.high %v65_v25, %v69_v26  ;;  %v77_v36 = vld [vmem:[%s4452_s1 + $0x78] sm:$0xff] }
  0x2c   :  { %v230_v27 = vsel %vm228_vm0, %v3061_v19, 0  ;;  %v3058_v37 = vcombine.high %v72_v30, %v76_v31  ;;  %v80_v38 = vld [vmem:[%s4452_s1 + $0x90] sm:$0x33]  ;;  %v3051_v39 = vcombine.low %v65_v25, %v69_v26  ;;  %v3060_v40 = vcombine.high %v73_v34, %v77_v36  ;;  %v81_v42 = vld [vmem:[%s4452_s1 + $0x98] sm:$0x33] }
  0x2d   :  { %v236_v32 = vsel %vm228_vm0, %v3063_v24, 0  ;;  %v3057_v41 = vcombine.low %v72_v30, %v76_v31  ;;  %v3066_v43 = vcombine.high %v80_v38, %v80_v38  ;;  %v3065_v44 = vcombine.low %v80_v38, %v80_v38  ;;  %v3525_v49 = vld [vmem:[#allocation2 + $0x4] ss:$16 sps:$4 sm:$0xff]   ;;  %v3528_v51 = vld [vmem:[#allocation2 + $0xc] ss:$16 sps:$4 sm:$0xff]  }
  0x2e   :  { %256 = vmatpush1.bf16.msra.mxu0 %v3053_v15  ;;  %297 = vmatpush1.bf16.msra.mxu1 %v3055_v20  ;;  %v3059_v45 = vcombine.low %v73_v34, %v77_v36  ;;  %v3068_v46 = vcombine.high %v81_v42, %v81_v42  ;;  %v3067_v47 = vcombine.low %v81_v42, %v81_v42  ;;  %v3523_v52 = vld [vmem:[#allocation2] ss:$16 sps:$4 sm:$0xff]   ;;  %v3531_v53 = vld [vmem:[#allocation2 + $0x24] ss:$16 sps:$4 sm:$0xff]   ;;  %v3526_v54 = vld [vmem:[#allocation2 + $0x8] ss:$16 sps:$4 sm:$0xff]  }
  0x2f   :  { %3069 = vmatprep.subr.msk.bf16.mxu0 %vm228_vm0, %v3062_v18  ;;  %3071 = vmatprep.subr.msk.bf16.mxu1 %vm228_vm0, %v3064_v23  ;;  %v242_v48 = vsel %vm228_vm0, %v3065_v44, 0  ;;  %v3534_v55 = vld [vmem:[#allocation2 + $0x2c] ss:$16 sps:$4 sm:$0xff]   ;;  %v3529_v56 = vld [vmem:[#allocation2 + $0x20] ss:$16 sps:$4 sm:$0xff]  }
  0x30   :  { %v248_v50 = vsel %vm228_vm0, %v3067_v47, 0  ;;  %v3537_v57 = vld [vmem:[#allocation2 + $0x44] ss:$16 sps:$4 sm:$0xff]   ;;  %v3532_v58 = vld [vmem:[#allocation2 + $0x28] ss:$16 sps:$4 sm:$0xff]  }
  0x31   :  { %v3540_v59 = vld [vmem:[#allocation2 + $0x4c] ss:$16 sps:$4 sm:$0xff]   ;;  %v3535_v60 = vld [vmem:[#allocation2 + $0x40] ss:$16 sps:$4 sm:$0xff]   ;;  %v3543_v61 = vld [vmem:[#allocation2 + $0x64] ss:$16 sps:$4 sm:$0xff]  }
  0x32   :  { %258 = vmatpush1.bf16.msra.mxu0 %v230_v27  ;;  %299 = vmatpush1.bf16.msra.mxu1 %v236_v32  ;;  %v3538_v62 = vld [vmem:[#allocation2 + $0x48] ss:$16 sps:$4 sm:$0xff]   ;;  %v3546_v63 = vld [vmem:[#allocation2 + $0x6c] ss:$16 sps:$4 sm:$0xff]   ;;  %v3549_v1 = vld [vmem:[#allocation2 + $0x84] ss:$16 sps:$4 sm:$0xff]  }
  0x33   :  { %335 = vmatprep.subr.bf16.mxu0 %v3050_v28  ;;  %376 = vmatprep.subr.bf16.mxu1 %v3052_v33  ;;  %v3544_v2 = vld [vmem:[#allocation2 + $0x68] ss:$16 sps:$4 sm:$0xff]   ;;  %v3552_v3 = vld [vmem:[#allocation2 + $0x8c] ss:$16 sps:$4 sm:$0xff]   ;;  %v3547_v4 = vld [vmem:[#allocation2 + $0x80] ss:$16 sps:$4 sm:$0xff]  }
  0x34   :  { %v3555_v5 = vld [vmem:[#allocation2 + $0xa4] ss:$16 sps:$4 sm:$0xff]   ;;  %v3550_v6 = vld [vmem:[#allocation2 + $0x88] ss:$16 sps:$4 sm:$0xff]   ;;  %v3553_v7 = vld [vmem:[#allocation2 + $0xa0] ss:$16 sps:$4 sm:$0xff]  }
  0x35   :  { %3070 = vmatmul.mubr.msk.bf16.vlgmr.msra.gmra.mrb[0].mxu0 %vm224_vm1, %v61_v29  ;;  %3072 = vmatmul.mubr.msk.bf16.vlgmr.msra.gmra.mrb[0].mxu1 %vm224_vm1, %v61_v29  ;;  %v3558_v8 = vld [vmem:[#allocation2 + $0xac] ss:$16 sps:$4 sm:$0xff]   ;;  %v3556_v9 = vld [vmem:[#allocation2 + $0xa8] ss:$16 sps:$4 sm:$0xff]   ;;  %v3561_v10 = vld [vmem:[#allocation2 + $0xc4] ss:$16 sps:$4 sm:$0xff]  }
  0x36   :  { %336 = vmatpush1.bf16.msra.mxu0 %v3049_v35  ;;  %367 = vmatprep.mubr.bf16.mxu0 %v4023_v0  ;;  %v3564_v11 = vld [vmem:[#allocation2 + $0xcc] ss:$16 sps:$4 sm:$0xff]   ;;  %v3559_v12 = vld [vmem:[#allocation2 + $0xc0] ss:$16 sps:$4 sm:$0xff]   ;;  %v3567_v13 = vld [vmem:[#allocation2 + $0xe4] ss:$16 sps:$4 sm:$0xff]  }
  0x37   :  { %337 = vmatprep.subr.bf16.mxu0 %v3058_v37  ;;  %377 = vmatpush1.bf16.msra.mxu1 %v3051_v39  ;;  %v3562_v14 = vld [vmem:[#allocation2 + $0xc8] ss:$16 sps:$4 sm:$0xff]   ;;  %v3570_v15 = vld [vmem:[#allocation2 + $0xec] ss:$16 sps:$4 sm:$0xff]   ;;  %v3565_v16 = vld [vmem:[#allocation2 + $0xe0] ss:$16 sps:$4 sm:$0xff]  }
  0x38   :  { %408 = vmatprep.mubr.bf16.mxu1 %v4023_v0  ;;  %378 = vmatprep.subr.bf16.mxu1 %v3060_v40  ;;  %v3541_v0 = vld [vmem:[#allocation2 + $0x60] ss:$16 sps:$4 sm:$0xff]   ;;  %v3573_v17 = vld [vmem:[#allocation2 + $0x104] ss:$16 sps:$4 sm:$0xff]   ;;  %v3568_v18 = vld [vmem:[#allocation2 + $0xe8] ss:$16 sps:$4 sm:$0xff]  }
  0x39   :  { %v3576_v19 = vld [vmem:[#allocation2 + $0x10c] ss:$16 sps:$4 sm:$0xff]   ;;  %v3571_v20 = vld [vmem:[#allocation2 + $0x100] ss:$16 sps:$4 sm:$0xff]   ;;  %v3579_v21 = vld [vmem:[#allocation2 + $0x124] ss:$16 sps:$4 sm:$0xff]  }
  0x3a   :  { %338 = vmatpush1.bf16.msra.mxu0 %v3057_v41  ;;  %v3574_v22 = vld [vmem:[#allocation2 + $0x108] ss:$16 sps:$4 sm:$0xff]   ;;  %v3582_v23 = vld [vmem:[#allocation2 + $0x12c] ss:$16 sps:$4 sm:$0xff]   ;;  %v3577_v24 = vld [vmem:[#allocation2 + $0x120] ss:$16 sps:$4 sm:$0xff]  }
  0x3b   :  { %3073 = vmatprep.subr.msk.bf16.mxu0 %vm228_vm0, %v3066_v43  ;;  %379 = vmatpush1.bf16.msra.mxu1 %v3059_v45  ;;  %v3585_v25 = vld [vmem:[#allocation2 + $0x144] ss:$16 sps:$4 sm:$0xff]   ;;  %v3580_v26 = vld [vmem:[#allocation2 + $0x128] ss:$16 sps:$4 sm:$0xff]   ;;  %v3588_v27 = vld [vmem:[#allocation2 + $0x14c] ss:$16 sps:$4 sm:$0xff]  }
  0x3c   :  { %3075 = vmatprep.subr.msk.bf16.mxu1 %vm228_vm0, %v3068_v46  ;;  %v3583_v28 = vld [vmem:[#allocation2 + $0x140] ss:$16 sps:$4 sm:$0xff]   ;;  %v3586_v30 = vld [vmem:[#allocation2 + $0x148] ss:$16 sps:$4 sm:$0xff]   ;;  %v3594_v31 = vld [vmem:[#allocation2 + $0x16c] ss:$16 sps:$4 sm:$0xff]  }
  0x3d   :  { %v3589_v32 = vld [vmem:[#allocation2 + $0x160] ss:$16 sps:$4 sm:$0xff]   ;;  %v3597_v33 = vld [vmem:[#allocation2 + $0x184] ss:$16 sps:$4 sm:$0xff]   ;;  %v3592_v34 = vld [vmem:[#allocation2 + $0x168] ss:$16 sps:$4 sm:$0xff]  }
  0x3e   :  { %340 = vmatpush1.bf16.msra.mxu0 %v242_v48  ;;  %v3600_v35 = vld [vmem:[#allocation2 + $0x18c] ss:$16 sps:$4 sm:$0xff]   ;;  %v3595_v36 = vld [vmem:[#allocation2 + $0x180] ss:$16 sps:$4 sm:$0xff]   ;;  %v3603_v37 = vld [vmem:[#allocation2 + $0x1a4] ss:$16 sps:$4 sm:$0xff]  }
  0x3f   :  { %1223 = vmatprep.subr.bf16.mxu0 %v3525_v49  ;;  %381 = vmatpush1.bf16.msra.mxu1 %v248_v50  ;;  %v3598_v38 = vld [vmem:[#allocation2 + $0x188] ss:$16 sps:$4 sm:$0xff]   ;;  %v3606_v39 = vld [vmem:[#allocation2 + $0x1ac] ss:$16 sps:$4 sm:$0xff]   ;;  %v3601_v40 = vld [vmem:[#allocation2 + $0x1a0] ss:$16 sps:$4 sm:$0xff]  }
  0x40   :  { %1305 = vmatprep.subr.bf16.mxu1 %v3528_v51  ;;  %v3604_v41 = vld [vmem:[#allocation2 + $0x1a8] ss:$16 sps:$4 sm:$0xff]   ;;  %v3609_v42 = vld [vmem:[#allocation2 + $0x1c4] ss:$16 sps:$4 sm:$0xff]   ;;  %v3612_v43 = vld [vmem:[#allocation2 + $0x1cc] ss:$16 sps:$4 sm:$0xff]  }
  0x41   :  { %3074 = vmatmul.mubr.msk.bf16.vlgmr.msra.gmra.mrb[4].mxu0 %vm224_vm1, %v61_v29  ;;  %v3607_v44 = vld [vmem:[#allocation2 + $0x1c0] ss:$16 sps:$4 sm:$0xff]   ;;  %v3610_v45 = vld [vmem:[#allocation2 + $0x1c8] ss:$16 sps:$4 sm:$0xff]   ;;  %v3615_v46 = vld [vmem:[#allocation2 + $0x1e4] ss:$16 sps:$4 sm:$0xff]  }
  0x42   :  { %1224 = vmatpush1.bf16.msra.mxu0 %v3523_v52  ;;  %3076 = vmatmul.mubr.msk.bf16.vlgmr.msra.gmra.mrb[4].mxu1 %vm224_vm1, %v61_v29  ;;  %v3591_v29 = vld [vmem:[#allocation2 + $0x164] ss:$16 sps:$4 sm:$0xff]   ;;  %v3618_v47 = vld [vmem:[#allocation2 + $0x1ec] ss:$16 sps:$4 sm:$0xff]   ;;  %v3613_v48 = vld [vmem:[#allocation2 + $0x1e0] ss:$16 sps:$4 sm:$0xff]   ;;  %v84_v52 = vlaneseq }
  0x43   :  { %1225 = vmatprep.subr.bf16.mxu0 %v3531_v53  ;;  %1306 = vmatpush1.bf16.msra.mxu1 %v3526_v54  ;;  %v3616_v49 = vld [vmem:[#allocation2 + $0x1e8] ss:$16 sps:$4 sm:$0xff]   ;;  %v3621_v50 = vld [vmem:[#allocation2 + $0x204] ss:$16 sps:$4 sm:$0xff]   ;;  %v3624_v51 = vld [vmem:[#allocation2 + $0x20c] ss:$16 sps:$4 sm:$0xff]  }
  0x44   :  { %1307 = vmatprep.subr.bf16.mxu1 %v3534_v55  ;;  %v4177_v53 = vshrl.u32 %v84_v52, 7  ;;  %v4185_v55 = vld [vmem:[%s4453_s2] sm:$0xff] }
  0x45   :  { %v3669_v52 = vld [vmem:[#allocation2 + $0x304] ss:$16 sps:$4 sm:$0xff]  }
  0x46   :  { %1226 = vmatpush1.bf16.msra.mxu0 %v3529_v56  ;;  %v4180_v54 = vsub.s32 0, %v4177_v53  ;;  %v4188_v56 = vsub.s32 1, %v4177_v53 }
  0x47   :  { %1227 = vmatprep.subr.bf16.mxu0 %v3537_v57  ;;  %1308 = vmatpush1.bf16.msra.mxu1 %v3532_v58  ;;  %v4191_v57 = vsub.s32 3, %v4177_v53 }
  0x48   :  { %1309 = vmatprep.subr.bf16.mxu1 %v3540_v59  ;;  %v87_v58 = vrot.slane %v4185_v55, %v4180_v54  ;;  %v91_v59 = vrot.slane %v4185_v55, %v4188_v56 }
  0x4a   :  { %1228 = vmatpush1.bf16.msra.mxu0 %v3535_v60 }
  0x4b   :  { %1229 = vmatprep.subr.bf16.mxu0 %v3543_v61  ;;  %1310 = vmatpush1.bf16.msra.mxu1 %v3538_v62  ;;  %v99_v61 = vrot.slane %v4185_v55, %v4191_v57 }
  0x4c   :  { %1311 = vmatprep.subr.bf16.mxu1 %v3546_v63 }
  0x4e   :  { %1230 = vmatpush1.bf16.msra.mxu0 %v3541_v0 }
  0x4f   :  { %1231 = vmatprep.subr.bf16.mxu0 %v3549_v1  ;;  %1312 = vmatpush1.bf16.msra.mxu1 %v3544_v2 }
  0x50   :  { %1313 = vmatprep.subr.bf16.mxu1 %v3552_v3 }
  0x52   :  { %1232 = vmatpush1.bf16.msra.mxu0 %v3547_v4 }
  0x53   :  { %1233 = vmatprep.subr.bf16.mxu0 %v3555_v5  ;;  %1314 = vmatpush1.bf16.msra.mxu1 %v3550_v6 }
  0x54   :  { %1315 = vmatprep.subr.bf16.mxu1 %v3558_v8 }
  0x56   :  { %1234 = vmatpush1.bf16.msra.mxu0 %v3553_v7 }
  0x57   :  { %1235 = vmatprep.subr.bf16.mxu0 %v3561_v10  ;;  %1316 = vmatpush1.bf16.msra.mxu1 %v3556_v9 }
  0x58   :  { %1317 = vmatprep.subr.bf16.mxu1 %v3564_v11  ;;  %v3619_v11 = vld [vmem:[#allocation2 + $0x200] ss:$16 sps:$4 sm:$0xff]  }
  0x5a   :  { %1236 = vmatpush1.bf16.msra.mxu0 %v3559_v12  ;;  %v3622_v12 = vld [vmem:[#allocation2 + $0x208] ss:$16 sps:$4 sm:$0xff]  }
  0x5b   :  { %1237 = vmatprep.subr.bf16.mxu0 %v3567_v13  ;;  %1318 = vmatpush1.bf16.msra.mxu1 %v3562_v14 }
  0x5c   :  { %1319 = vmatprep.subr.bf16.mxu1 %v3570_v15  ;;  %v3627_v15 = vld [vmem:[#allocation2 + $0x224] ss:$16 sps:$4 sm:$0xff]  }
  0x5e   :  { %1238 = vmatpush1.bf16.msra.mxu0 %v3565_v16  ;;  %v3630_v16 = vld [vmem:[#allocation2 + $0x22c] ss:$16 sps:$4 sm:$0xff]  }
  0x5f   :  { %1239 = vmatprep.subr.bf16.mxu0 %v3573_v17  ;;  %1320 = vmatpush1.bf16.msra.mxu1 %v3568_v18  ;;  %v3625_v18 = vld [vmem:[#allocation2 + $0x220] ss:$16 sps:$4 sm:$0xff]  }
  0x60   :  { %1321 = vmatprep.subr.bf16.mxu1 %v3576_v19  ;;  %v3628_v19 = vld [vmem:[#allocation2 + $0x228] ss:$16 sps:$4 sm:$0xff]  }
  0x62   :  { %1240 = vmatpush1.bf16.msra.mxu0 %v3571_v20  ;;  %v3633_v20 = vld [vmem:[#allocation2 + $0x244] ss:$16 sps:$4 sm:$0xff]  }
  0x63   :  { %1241 = vmatprep.subr.bf16.mxu0 %v3579_v21  ;;  %1322 = vmatpush1.bf16.msra.mxu1 %v3574_v22  ;;  %v3636_v21 = vld [vmem:[#allocation2 + $0x24c] ss:$16 sps:$4 sm:$0xff]  }
  0x64   :  { %1323 = vmatprep.subr.bf16.mxu1 %v3582_v23 }
  0x66   :  { %1242 = vmatpush1.bf16.msra.mxu0 %v3577_v24  ;;  %v3631_v24 = vld [vmem:[#allocation2 + $0x240] ss:$16 sps:$4 sm:$0xff]  }
  0x67   :  { %1243 = vmatprep.subr.bf16.mxu0 %v3585_v25  ;;  %1324 = vmatpush1.bf16.msra.mxu1 %v3580_v26  ;;  %v3634_v25 = vld [vmem:[#allocation2 + $0x248] ss:$16 sps:$4 sm:$0xff]  }
  0x68   :  { %1325 = vmatprep.subr.bf16.mxu1 %v3588_v27  ;;  %v3639_v27 = vld [vmem:[#allocation2 + $0x264] ss:$16 sps:$4 sm:$0xff]  }
  0x6a   :  { %1244 = vmatpush1.bf16.msra.mxu0 %v3583_v28  ;;  %v3642_v28 = vld [vmem:[#allocation2 + $0x26c] ss:$16 sps:$4 sm:$0xff]  }
  0x6b   :  { %1245 = vmatprep.subr.bf16.mxu0 %v3591_v29  ;;  %1326 = vmatpush1.bf16.msra.mxu1 %v3586_v30  ;;  %v3637_v30 = vld [vmem:[#allocation2 + $0x260] ss:$16 sps:$4 sm:$0xff]  }
  0x6c   :  { %1327 = vmatprep.subr.bf16.mxu1 %v3594_v31  ;;  %v3640_v31 = vld [vmem:[#allocation2 + $0x268] ss:$16 sps:$4 sm:$0xff]  }
  0x6e   :  { %1246 = vmatpush1.bf16.msra.mxu0 %v3589_v32  ;;  %v3645_v32 = vld [vmem:[#allocation2 + $0x284] ss:$16 sps:$4 sm:$0xff]  }
  0x6f   :  { %1247 = vmatprep.subr.bf16.mxu0 %v3597_v33  ;;  %1328 = vmatpush1.bf16.msra.mxu1 %v3592_v34  ;;  %v3648_v33 = vld [vmem:[#allocation2 + $0x28c] ss:$16 sps:$4 sm:$0xff]   ;;  %v3643_v34 = vld [vmem:[#allocation2 + $0x280] ss:$16 sps:$4 sm:$0xff]  }
  0x70   :  { %1329 = vmatprep.subr.bf16.mxu1 %v3600_v35  ;;  %v3646_v35 = vld [vmem:[#allocation2 + $0x288] ss:$16 sps:$4 sm:$0xff]  }
  0x72   :  { %1248 = vmatpush1.bf16.msra.mxu0 %v3595_v36  ;;  %v3651_v36 = vld [vmem:[#allocation2 + $0x2a4] ss:$16 sps:$4 sm:$0xff]  }
  0x73   :  { %1249 = vmatprep.subr.bf16.mxu0 %v3603_v37  ;;  %1330 = vmatpush1.bf16.msra.mxu1 %v3598_v38  ;;  %v3654_v37 = vld [vmem:[#allocation2 + $0x2ac] ss:$16 sps:$4 sm:$0xff]   ;;  %v3649_v38 = vld [vmem:[#allocation2 + $0x2a0] ss:$16 sps:$4 sm:$0xff]  }
  0x74   :  { %1331 = vmatprep.subr.bf16.mxu1 %v3606_v39  ;;  %v3652_v39 = vld [vmem:[#allocation2 + $0x2a8] ss:$16 sps:$4 sm:$0xff]  }
  0x76   :  { %1250 = vmatpush1.bf16.msra.mxu0 %v3601_v40 }
  0x77   :  { %1332 = vmatpush1.bf16.msra.mxu1 %v3604_v41  ;;  %1251 = vmatprep.subr.bf16.mxu0 %v3609_v42  ;;  %v3657_v41 = vld [vmem:[#allocation2 + $0x2c4] ss:$16 sps:$4 sm:$0xff]   ;;  %v3660_v42 = vld [vmem:[#allocation2 + $0x2cc] ss:$16 sps:$4 sm:$0xff]  }
  0x78   :  { %1333 = vmatprep.subr.bf16.mxu1 %v3612_v43 }
  0x7a   :  { %1252 = vmatpush1.bf16.msra.mxu0 %v3607_v44 }
  0x7b   :  { %1334 = vmatpush1.bf16.msra.mxu1 %v3610_v45  ;;  %1253 = vmatprep.subr.bf16.mxu0 %v3615_v46  ;;  %v3655_v46 = vld [vmem:[#allocation2 + $0x2c0] ss:$16 sps:$4 sm:$0xff]  }
  0x7c   :  { %1335 = vmatprep.subr.bf16.mxu1 %v3618_v47  ;;  %v3658_v47 = vld [vmem:[#allocation2 + $0x2c8] ss:$16 sps:$4 sm:$0xff]  }
  0x7e   :  { %1254 = vmatpush1.bf16.msra.mxu0 %v3613_v48  ;;  %v3663_v48 = vld [vmem:[#allocation2 + $0x2e4] ss:$16 sps:$4 sm:$0xff]  }
  0x7f   :  { %1336 = vmatpush1.bf16.msra.mxu1 %v3616_v49  ;;  %1264 = vmatprep.subr.bf16.mxu0 %v3621_v50  ;;  %v3666_v49 = vld [vmem:[#allocation2 + $0x2ec] ss:$16 sps:$4 sm:$0xff]   ;;  %v3661_v50 = vld [vmem:[#allocation2 + $0x2e0] ss:$16 sps:$4 sm:$0xff]  }
  0x80   :  { %1346 = vmatprep.subr.bf16.mxu1 %v3624_v51  ;;  %v3664_v51 = vld [vmem:[#allocation2 + $0x2e8] ss:$16 sps:$4 sm:$0xff]  }
 0x108   :  { %v287_v60 = vpop.f32.mrb[0].mxu0  ;;  %v4199_v2 = vpop.f32.mrb[0].mxu1 }
 0x109   :  { %v288_v62 = vadd.f32 %v287_v60, %v87_v58  ;;  %v289_v63 = vpop.f32.mrb[1].mxu0  ;;  %v330_v5 = vpop.f32.mrb[1].mxu1  ;;  %v3672_v58 = vld [vmem:[#allocation2 + $0x30c] ss:$16 sps:$4 sm:$0xff]   ;;  %v3670_v60 = vld [vmem:[#allocation2 + $0x308] ss:$16 sps:$4 sm:$0xff]  }
 0x10a   :  { %v290_v0 = vadd.f32 %v289_v63, %v91_v59  ;;  %v291_v1 = vpop.f32.mrb[2].mxu0  ;;  %v331_v7 = vadd.f32 %v330_v5, %v99_v61  ;;  %v332_v8 = vpop.f32.mrb[2].mxu1  ;;  %v3667_v59 = vld [vmem:[#allocation2 + $0x300] ss:$16 sps:$4 sm:$0xff]   ;;  %v3675_v61 = vld [vmem:[#allocation2 + $0x324] ss:$16 sps:$4 sm:$0xff]  }
 0x10b   :  { %v417_v3 = vmax.f32 %v288_v62, 0.0  ;;  %v292_v4 = vpop.f32.mrb[3].mxu0  ;;  %v333_v9 = vpop.f32.mrb[3].mxu1  ;;  %v3678_v62 = vld [vmem:[#allocation2 + $0x32c] ss:$16 sps:$4 sm:$0xff]  }
 0x10c   :  { %v418_v6 = vmax.f32 %v290_v0, 0.0  ;;  %v420_v13 = vmax.f32 %v331_v7, 0.0  ;;  %v3673_v63 = vld [vmem:[#allocation2 + $0x320] ss:$16 sps:$4 sm:$0xff]   ;;  %v3676_v0 = vld [vmem:[#allocation2 + $0x328] ss:$16 sps:$4 sm:$0xff]  }
 0x10d   :  { %v425_v14 = vpack.c.bf16 %v417_v3, %v417_v3  ;;  %v3681_v1 = vld [vmem:[#allocation2 + $0x344] ss:$16 sps:$4 sm:$0xff]   ;;  %v3684_v3 = vld [vmem:[#allocation2 + $0x34c] ss:$16 sps:$4 sm:$0xff]   ;;  %v3679_v4 = vld [vmem:[#allocation2 + $0x340] ss:$16 sps:$4 sm:$0xff]  }
 0x10e   :  { %v426_v10 = vpack.c.bf16 %v418_v6, %v418_v6  ;;  %v428_v17 = vpack.c.bf16 %v420_v13, %v420_v13  ;;  %v3682_v5 = vld [vmem:[#allocation2 + $0x348] ss:$16 sps:$4 sm:$0xff]   ;;  %v3687_v6 = vld [vmem:[#allocation2 + $0x364] ss:$16 sps:$4 sm:$0xff]   ;;  %v3690_v7 = vld [vmem:[#allocation2 + $0x36c] ss:$16 sps:$4 sm:$0xff]  }
 0x10f   :  { %v3685_v8 = vld [vmem:[#allocation2 + $0x360] ss:$16 sps:$4 sm:$0xff]   ;;  %v3688_v9 = vld [vmem:[#allocation2 + $0x368] ss:$16 sps:$4 sm:$0xff]  }
 0x110   :  { %1255 = vmatprep.mubr.bf16.mxu0 %v426_v10  ;;  %1337 = vmatprep.mubr.bf16.mxu1 %v426_v10  ;;  %v3693_v10 = vld [vmem:[#allocation2 + $0x384] ss:$16 sps:$4 sm:$0xff]   ;;  %v3691_v13 = vld [vmem:[#allocation2 + $0x380] ss:$16 sps:$4 sm:$0xff]  }
 0x111   :  { %1256 = vmatmul.mubr.bf16.vlgmr.msra.gmra.mrb[8].mxu0 %v425_v14  ;;  %1338 = vmatmul.mubr.bf16.vlgmr.msra.gmra.mrb[8].mxu1 %v425_v14  ;;  %v3694_v14 = vld [vmem:[#allocation2 + $0x388] ss:$16 sps:$4 sm:$0xff]  }
 0x112   :  { %1265 = vmatpush1.bf16.msra.mxu0 %v3619_v11  ;;  %1347 = vmatpush1.bf16.msra.mxu1 %v3622_v12  ;;  %v3696_v11 = vld [vmem:[#allocation2 + $0x38c] ss:$16 sps:$4 sm:$0xff]   ;;  %v4210_v12 = vsub.s32 2, %v4177_v53 }
 0x113   :  { %1266 = vmatprep.subr.bf16.mxu0 %v3627_v15  ;;  %1348 = vmatprep.subr.bf16.mxu1 %v3630_v16  ;;  %v3699_v15 = vld [vmem:[#allocation2 + $0x3a4] ss:$16 sps:$4 sm:$0xff]   ;;  %v3702_v16 = vld [vmem:[#allocation2 + $0x3ac] ss:$16 sps:$4 sm:$0xff]  }
 0x114   :  { %1296 = vmatprep.mubr.bf16.mxu0 %v428_v17  ;;  %1378 = vmatprep.mubr.bf16.mxu1 %v428_v17  ;;  %v4201_v22 = vpop.f32.mrb[4].mxu0  ;;  %v106_v17 = vsub.s32 5, %v4177_v53 }
 0x115   :  { %v4203_v23 = vpop.f32.mrb[5].mxu0  ;;  %v4205_v40 = vpop.f32.mrb[4].mxu1 }
 0x116   :  { %1267 = vmatpush1.bf16.msra.mxu0 %v3625_v18  ;;  %1349 = vmatpush1.bf16.msra.mxu1 %v3628_v19  ;;  %v373_v26 = vpop.f32.mrb[6].mxu0  ;;  %v4207_v43 = vpop.f32.mrb[5].mxu1  ;;  %v95_v18 = vrot.slane %v4185_v55, %v4210_v12  ;;  %v3697_v19 = vld [vmem:[#allocation2 + $0x3a0] ss:$16 sps:$4 sm:$0xff]  }
 0x117   :  { %1268 = vmatprep.subr.bf16.mxu0 %v3633_v20  ;;  %1350 = vmatprep.subr.bf16.mxu1 %v3636_v21  ;;  %v374_v29 = vpop.f32.mrb[7].mxu0  ;;  %v414_v44 = vpop.f32.mrb[6].mxu1  ;;  %v3700_v20 = vld [vmem:[#allocation2 + $0x3a8] ss:$16 sps:$4 sm:$0xff]   ;;  %v3705_v21 = vld [vmem:[#allocation2 + $0x3c4] ss:$16 sps:$4 sm:$0xff]  }
 0x118   :  { %v415_v45 = vpop.f32.mrb[7].mxu1  ;;  %v329_v26 = vadd.f32 %v4199_v2, %v95_v18  ;;  %v3711_v29 = vld [vmem:[#allocation2 + $0x3e4] ss:$16 sps:$4 sm:$0xff]   ;;  %v3721_v44 = vld [vmem:[#allocation4 + $0x20] ss:$16 sps:$4 sm:$0xff]  }
 0x119   :  { %v3724_v45 = vld [vmem:[#allocation4 + $0x28] ss:$16 sps:$4 sm:$0xff]   ;;  %v3774_v18 = vld [vmem:[#allocation4 + $0x12c] ss:$16 sps:$4 sm:$0xff]  }
 0x11a   :  { %1269 = vmatpush1.bf16.msra.mxu0 %v3631_v24  ;;  %1351 = vmatpush1.bf16.msra.mxu1 %v3634_v25  ;;  %v3708_v24 = vld [vmem:[#allocation2 + $0x3cc] ss:$16 sps:$4 sm:$0xff]   ;;  %v107_v25 = vrot.slane %v4185_v55, %v106_v17  ;;  %v3771_v17 = vld [vmem:[#allocation4 + $0x124] ss:$16 sps:$4 sm:$0xff]  }
 0x11b   :  { %1270 = vmatprep.subr.bf16.mxu0 %v3639_v27  ;;  %1352 = vmatprep.subr.bf16.mxu1 %v3642_v28  ;;  %v3703_v27 = vld [vmem:[#allocation2 + $0x3c0] ss:$16 sps:$4 sm:$0xff]   ;;  %v3706_v28 = vld [vmem:[#allocation2 + $0x3c8] ss:$16 sps:$4 sm:$0xff]  }
 0x11e   :  { %1271 = vmatpush1.bf16.msra.mxu0 %v3637_v30  ;;  %1353 = vmatpush1.bf16.msra.mxu1 %v3640_v31  ;;  %v3714_v30 = vld [vmem:[#allocation2 + $0x3ec] ss:$16 sps:$4 sm:$0xff]   ;;  %v372_v31 = vadd.f32 %v4203_v23, %v107_v25  ;;  %v3775_v25 = vld [vmem:[#allocation4 + $0x140] ss:$16 sps:$4 sm:$0xff]  }
 0x11f   :  { %1272 = vmatprep.subr.bf16.mxu0 %v3645_v32  ;;  %1354 = vmatprep.subr.bf16.mxu1 %v3648_v33  ;;  %v419_v32 = vmax.f32 %v329_v26, 0.0  ;;  %v3709_v33 = vld [vmem:[#allocation2 + $0x3e0] ss:$16 sps:$4 sm:$0xff]   ;;  %v3778_v26 = vld [vmem:[#allocation4 + $0x148] ss:$16 sps:$4 sm:$0xff]  }
 0x120   :  { %v422_v2 = vmax.f32 %v372_v31, 0.0  ;;  %v3789_v31 = vld [vmem:[#allocation4 + $0x184] ss:$16 sps:$4 sm:$0xff]  }
 0x122   :  { %1273 = vmatpush1.bf16.msra.mxu0 %v3643_v34  ;;  %1355 = vmatpush1.bf16.msra.mxu1 %v3646_v35  ;;  %v3712_v34 = vld [vmem:[#allocation2 + $0x3e8] ss:$16 sps:$4 sm:$0xff]   ;;  %v3717_v35 = vld [vmem:[#allocation4 + $0x4] ss:$16 sps:$4 sm:$0xff]   ;;  %v430_v23 = vpack.c.bf16 %v422_v2, %v422_v2  ;;  %v3798_v2 = vld [vmem:[#allocation4 + $0x1ac] ss:$16 sps:$4 sm:$0xff]  }
 0x123   :  { %1274 = vmatprep.subr.bf16.mxu0 %v3651_v36  ;;  %1356 = vmatprep.subr.bf16.mxu1 %v3654_v37  ;;  %v3720_v36 = vld [vmem:[#allocation4 + $0xc] ss:$16 sps:$4 sm:$0xff]   ;;  %v427_v37 = vpack.c.bf16 %v419_v32, %v419_v32 }
 0x124   :  { %v3792_v32 = vld [vmem:[#allocation4 + $0x18c] ss:$16 sps:$4 sm:$0xff]  }
 0x126   :  { %1275 = vmatpush1.bf16.msra.mxu0 %v3649_v38  ;;  %1357 = vmatpush1.bf16.msra.mxu1 %v3652_v39  ;;  %v3715_v38 = vld [vmem:[#allocation4] ss:$16 sps:$4 sm:$0xff]   ;;  %v3718_v39 = vld [vmem:[#allocation4 + $0x8] ss:$16 sps:$4 sm:$0xff]  }
 0x127   :  { %1276 = vmatprep.subr.bf16.mxu0 %v3657_v41  ;;  %1358 = vmatprep.subr.bf16.mxu1 %v3660_v42  ;;  %v3723_v41 = vld [vmem:[#allocation4 + $0x24] ss:$16 sps:$4 sm:$0xff]   ;;  %v3726_v42 = vld [vmem:[#allocation4 + $0x2c] ss:$16 sps:$4 sm:$0xff]  }
 0x12a   :  { %1277 = vmatpush1.bf16.msra.mxu0 %v3655_v46  ;;  %1359 = vmatpush1.bf16.msra.mxu1 %v3658_v47  ;;  %v3729_v46 = vld [vmem:[#allocation4 + $0x44] ss:$16 sps:$4 sm:$0xff]   ;;  %v3732_v47 = vld [vmem:[#allocation4 + $0x4c] ss:$16 sps:$4 sm:$0xff]  }
 0x12b   :  { %1278 = vmatprep.subr.bf16.mxu0 %v3663_v48  ;;  %1360 = vmatprep.subr.bf16.mxu1 %v3666_v49  ;;  %v3727_v48 = vld [vmem:[#allocation4 + $0x40] ss:$16 sps:$4 sm:$0xff]   ;;  %v3730_v49 = vld [vmem:[#allocation4 + $0x48] ss:$16 sps:$4 sm:$0xff]  }
 0x12e   :  { %1279 = vmatpush1.bf16.msra.mxu0 %v3661_v50  ;;  %1361 = vmatpush1.bf16.msra.mxu1 %v3664_v51  ;;  %v3735_v50 = vld [vmem:[#allocation4 + $0x64] ss:$16 sps:$4 sm:$0xff]   ;;  %v3738_v51 = vld [vmem:[#allocation4 + $0x6c] ss:$16 sps:$4 sm:$0xff]  }
 0x12f   :  { %1280 = vmatprep.subr.bf16.mxu0 %v3669_v52  ;;  %1362 = vmatprep.subr.bf16.mxu1 %v3672_v58  ;;  %v3733_v52 = vld [vmem:[#allocation4 + $0x60] ss:$16 sps:$4 sm:$0xff]   ;;  %v3736_v58 = vld [vmem:[#allocation4 + $0x68] ss:$16 sps:$4 sm:$0xff]  }
 0x132   :  { %1281 = vmatpush1.bf16.msra.mxu0 %v3667_v59  ;;  %1363 = vmatpush1.bf16.msra.mxu1 %v3670_v60  ;;  %v3741_v59 = vld [vmem:[#allocation4 + $0x84] ss:$16 sps:$4 sm:$0xff]   ;;  %v3744_v60 = vld [vmem:[#allocation4 + $0x8c] ss:$16 sps:$4 sm:$0xff]  }
 0x133   :  { %1282 = vmatprep.subr.bf16.mxu0 %v3675_v61  ;;  %1364 = vmatprep.subr.bf16.mxu1 %v3678_v62  ;;  %v3739_v61 = vld [vmem:[#allocation4 + $0x80] ss:$16 sps:$4 sm:$0xff]   ;;  %v3742_v62 = vld [vmem:[#allocation4 + $0x88] ss:$16 sps:$4 sm:$0xff]  }
 0x136   :  { %1283 = vmatpush1.bf16.msra.mxu0 %v3673_v63  ;;  %1365 = vmatpush1.bf16.msra.mxu1 %v3676_v0  ;;  %v3747_v63 = vld [vmem:[#allocation4 + $0xa4] ss:$16 sps:$4 sm:$0xff]   ;;  %v3750_v0 = vld [vmem:[#allocation4 + $0xac] ss:$16 sps:$4 sm:$0xff]  }
 0x137   :  { %1284 = vmatprep.subr.bf16.mxu0 %v3681_v1  ;;  %1366 = vmatprep.subr.bf16.mxu1 %v3684_v3  ;;  %v3745_v1 = vld [vmem:[#allocation4 + $0xa0] ss:$16 sps:$4 sm:$0xff]   ;;  %v3748_v3 = vld [vmem:[#allocation4 + $0xa8] ss:$16 sps:$4 sm:$0xff]  }
 0x13a   :  { %1285 = vmatpush1.bf16.msra.mxu0 %v3679_v4  ;;  %1367 = vmatpush1.bf16.msra.mxu1 %v3682_v5  ;;  %v3753_v4 = vld [vmem:[#allocation4 + $0xc4] ss:$16 sps:$4 sm:$0xff]   ;;  %v3756_v5 = vld [vmem:[#allocation4 + $0xcc] ss:$16 sps:$4 sm:$0xff]  }
 0x13b   :  { %1286 = vmatprep.subr.bf16.mxu0 %v3687_v6  ;;  %1368 = vmatprep.subr.bf16.mxu1 %v3690_v7  ;;  %v3751_v6 = vld [vmem:[#allocation4 + $0xc0] ss:$16 sps:$4 sm:$0xff]   ;;  %v3754_v7 = vld [vmem:[#allocation4 + $0xc8] ss:$16 sps:$4 sm:$0xff]  }
 0x13e   :  { %1287 = vmatpush1.bf16.msra.mxu0 %v3685_v8  ;;  %1369 = vmatpush1.bf16.msra.mxu1 %v3688_v9  ;;  %v3759_v8 = vld [vmem:[#allocation4 + $0xe4] ss:$16 sps:$4 sm:$0xff]   ;;  %v3762_v9 = vld [vmem:[#allocation4 + $0xec] ss:$16 sps:$4 sm:$0xff]  }
 0x13f   :  { %1288 = vmatprep.subr.bf16.mxu0 %v3693_v10  ;;  %1370 = vmatprep.subr.bf16.mxu1 %v3696_v11  ;;  %v3757_v10 = vld [vmem:[#allocation4 + $0xe0] ss:$16 sps:$4 sm:$0xff]   ;;  %v3760_v11 = vld [vmem:[#allocation4 + $0xe8] ss:$16 sps:$4 sm:$0xff]  }
 0x142   :  { %1289 = vmatpush1.bf16.msra.mxu0 %v3691_v13  ;;  %1371 = vmatpush1.bf16.msra.mxu1 %v3694_v14  ;;  %v3765_v13 = vld [vmem:[#allocation4 + $0x104] ss:$16 sps:$4 sm:$0xff]   ;;  %v3768_v14 = vld [vmem:[#allocation4 + $0x10c] ss:$16 sps:$4 sm:$0xff]  }
 0x143   :  { %1290 = vmatprep.subr.bf16.mxu0 %v3699_v15  ;;  %1372 = vmatprep.subr.bf16.mxu1 %v3702_v16  ;;  %v3763_v15 = vld [vmem:[#allocation4 + $0x100] ss:$16 sps:$4 sm:$0xff]   ;;  %v3766_v16 = vld [vmem:[#allocation4 + $0x108] ss:$16 sps:$4 sm:$0xff]  }
 0x146   :  { %1291 = vmatpush1.bf16.msra.mxu0 %v3697_v19  ;;  %1373 = vmatpush1.bf16.msra.mxu1 %v3700_v20  ;;  %v3769_v19 = vld [vmem:[#allocation4 + $0x120] ss:$16 sps:$4 sm:$0xff]   ;;  %v3772_v20 = vld [vmem:[#allocation4 + $0x128] ss:$16 sps:$4 sm:$0xff]  }
 0x147   :  { %1292 = vmatprep.subr.bf16.mxu0 %v3705_v21  ;;  %1374 = vmatprep.subr.bf16.mxu1 %v3708_v24  ;;  %v3777_v21 = vld [vmem:[#allocation4 + $0x144] ss:$16 sps:$4 sm:$0xff]   ;;  %v3780_v24 = vld [vmem:[#allocation4 + $0x14c] ss:$16 sps:$4 sm:$0xff]  }
 0x14a   :  { %1293 = vmatpush1.bf16.msra.mxu0 %v3703_v27  ;;  %1375 = vmatpush1.bf16.msra.mxu1 %v3706_v28  ;;  %v3783_v27 = vld [vmem:[#allocation4 + $0x164] ss:$16 sps:$4 sm:$0xff]   ;;  %v3786_v28 = vld [vmem:[#allocation4 + $0x16c] ss:$16 sps:$4 sm:$0xff]  }
 0x14b   :  { %1294 = vmatprep.subr.bf16.mxu0 %v3711_v29  ;;  %1376 = vmatprep.subr.bf16.mxu1 %v3714_v30  ;;  %v3781_v29 = vld [vmem:[#allocation4 + $0x160] ss:$16 sps:$4 sm:$0xff]   ;;  %v3784_v30 = vld [vmem:[#allocation4 + $0x168] ss:$16 sps:$4 sm:$0xff]  }
 0x14e   :  { %1295 = vmatpush1.bf16.msra.mxu0 %v3709_v33  ;;  %1377 = vmatpush1.bf16.msra.mxu1 %v3712_v34  ;;  %v102_v33 = vsub.s32 4, %v4177_v53  ;;  %v3787_v34 = vld [vmem:[#allocation4 + $0x180] ss:$16 sps:$4 sm:$0xff]  }
 0x14f   :  { %2185 = vmatprep.subr.bf16.mxu0 %v3717_v35  ;;  %2267 = vmatprep.subr.bf16.mxu1 %v3720_v36  ;;  %v3790_v35 = vld [vmem:[#allocation4 + $0x188] ss:$16 sps:$4 sm:$0xff]   ;;  %v3795_v36 = vld [vmem:[#allocation4 + $0x1a4] ss:$16 sps:$4 sm:$0xff]  }
 0x151   :  { %1297 = vmatmul.mubr.bf16.vlgmr.msra.gmra.mrb[8].mxu0 %v427_v37  ;;  %1379 = vmatmul.mubr.bf16.vlgmr.msra.gmra.mrb[8].mxu1 %v427_v37  ;;  %v114_v37 = vsub.s32 7, %v4177_v53 }
 0x152   :  { %2186 = vmatpush1.bf16.msra.mxu0 %v3715_v38  ;;  %2268 = vmatpush1.bf16.msra.mxu1 %v3718_v39  ;;  %v103_v38 = vrot.slane %v4185_v55, %v102_v33  ;;  %v3793_v39 = vld [vmem:[#allocation4 + $0x1a0] ss:$16 sps:$4 sm:$0xff]   ;;  %v3864_v33 = vld [vmem:[#allocation4 + $0x30c] ss:$16 sps:$4 sm:$0xff]  }
 0x153   :  { %2187 = vmatprep.subr.bf16.mxu0 %v3723_v41  ;;  %2269 = vmatprep.subr.bf16.mxu1 %v3726_v42  ;;  %v3796_v41 = vld [vmem:[#allocation4 + $0x1a8] ss:$16 sps:$4 sm:$0xff]   ;;  %v3801_v42 = vld [vmem:[#allocation4 + $0x1c4] ss:$16 sps:$4 sm:$0xff]  }
 0x154   :  { %2217 = vmatprep.mubr.bf16.mxu0 %v430_v23  ;;  %2299 = vmatprep.mubr.bf16.mxu1 %v430_v23  ;;  %v3804_v23 = vld [vmem:[#allocation4 + $0x1cc] ss:$16 sps:$4 sm:$0xff]  }
 0x156   :  { %2188 = vmatpush1.bf16.msra.mxu0 %v3721_v44  ;;  %2270 = vmatpush1.bf16.msra.mxu1 %v3724_v45  ;;  %v115_v44 = vrot.slane %v4185_v55, %v114_v37  ;;  %v370_v45 = vadd.f32 %v4201_v22, %v103_v38  ;;  %v3865_v37 = vld [vmem:[#allocation4 + $0x320] ss:$16 sps:$4 sm:$0xff]   ;;  %v3868_v38 = vld [vmem:[#allocation4 + $0x328] ss:$16 sps:$4 sm:$0xff]  }
 0x157   :  { %2189 = vmatprep.subr.bf16.mxu0 %v3729_v46  ;;  %2271 = vmatprep.subr.bf16.mxu1 %v3732_v47  ;;  %v3799_v46 = vld [vmem:[#allocation4 + $0x1c0] ss:$16 sps:$4 sm:$0xff]   ;;  %v3802_v47 = vld [vmem:[#allocation4 + $0x1c8] ss:$16 sps:$4 sm:$0xff]  }
 0x15a   :  { %2190 = vmatpush1.bf16.msra.mxu0 %v3727_v48  ;;  %2272 = vmatpush1.bf16.msra.mxu1 %v3730_v49  ;;  %v3807_v48 = vld [vmem:[#allocation4 + $0x1e4] ss:$16 sps:$4 sm:$0xff]   ;;  %v3810_v49 = vld [vmem:[#allocation4 + $0x1ec] ss:$16 sps:$4 sm:$0xff]  }
 0x15b   :  { %2191 = vmatprep.subr.bf16.mxu0 %v3735_v50  ;;  %2273 = vmatprep.subr.bf16.mxu1 %v3738_v51  ;;  %v413_v50 = vadd.f32 %v4207_v43, %v115_v44  ;;  %v421_v51 = vmax.f32 %v370_v45, 0.0  ;;  %v3879_v44 = vld [vmem:[#allocation4 + $0x364] ss:$16 sps:$4 sm:$0xff]   ;;  %v3882_v45 = vld [vmem:[#allocation4 + $0x36c] ss:$16 sps:$4 sm:$0xff]  }
 0x15d   :  { %v424_v22 = vmax.f32 %v413_v50, 0.0  ;;  %v3883_v50 = vld [vmem:[#allocation4 + $0x380] ss:$16 sps:$4 sm:$0xff]  }
 0x15e   :  { %2192 = vmatpush1.bf16.msra.mxu0 %v3733_v52  ;;  %2274 = vmatpush1.bf16.msra.mxu1 %v3736_v58  ;;  %v3805_v52 = vld [vmem:[#allocation4 + $0x1e0] ss:$16 sps:$4 sm:$0xff]   ;;  %v3808_v58 = vld [vmem:[#allocation4 + $0x1e8] ss:$16 sps:$4 sm:$0xff]  }
 0x15f   :  { %2193 = vmatprep.subr.bf16.mxu0 %v3741_v59  ;;  %2275 = vmatprep.subr.bf16.mxu1 %v3744_v60  ;;  %v3813_v59 = vld [vmem:[#allocation4 + $0x204] ss:$16 sps:$4 sm:$0xff]   ;;  %v3816_v60 = vld [vmem:[#allocation4 + $0x20c] ss:$16 sps:$4 sm:$0xff]   ;;  %v432_v43 = vpack.c.bf16 %v424_v22, %v424_v22  ;;  %v3892_v22 = vld [vmem:[#allocation4 + $0x3a8] ss:$16 sps:$4 sm:$0xff]  }
 0x162   :  { %2194 = vmatpush1.bf16.msra.mxu0 %v3739_v61  ;;  %2276 = vmatpush1.bf16.msra.mxu1 %v3742_v62  ;;  %v429_v61 = vpack.c.bf16 %v421_v51, %v421_v51  ;;  %v3811_v62 = vld [vmem:[#allocation4 + $0x200] ss:$16 sps:$4 sm:$0xff]   ;;  %v3886_v51 = vld [vmem:[#allocation4 + $0x388] ss:$16 sps:$4 sm:$0xff]  }
 0x163   :  { %2195 = vmatprep.subr.bf16.mxu0 %v3747_v63  ;;  %2277 = vmatprep.subr.bf16.mxu1 %v3750_v0  ;;  %v3814_v63 = vld [vmem:[#allocation4 + $0x208] ss:$16 sps:$4 sm:$0xff]   ;;  %v3819_v0 = vld [vmem:[#allocation4 + $0x224] ss:$16 sps:$4 sm:$0xff]  }
 0x166   :  { %2196 = vmatpush1.bf16.msra.mxu0 %v3745_v1  ;;  %2278 = vmatpush1.bf16.msra.mxu1 %v3748_v3  ;;  %v3822_v1 = vld [vmem:[#allocation4 + $0x22c] ss:$16 sps:$4 sm:$0xff]   ;;  %v3817_v3 = vld [vmem:[#allocation4 + $0x220] ss:$16 sps:$4 sm:$0xff]  }
 0x167   :  { %2197 = vmatprep.subr.bf16.mxu0 %v3753_v4  ;;  %2279 = vmatprep.subr.bf16.mxu1 %v3756_v5  ;;  %v3820_v4 = vld [vmem:[#allocation4 + $0x228] ss:$16 sps:$4 sm:$0xff]   ;;  %v3825_v5 = vld [vmem:[#allocation4 + $0x244] ss:$16 sps:$4 sm:$0xff]  }
 0x16a   :  { %2198 = vmatpush1.bf16.msra.mxu0 %v3751_v6  ;;  %2280 = vmatpush1.bf16.msra.mxu1 %v3754_v7  ;;  %v3828_v6 = vld [vmem:[#allocation4 + $0x24c] ss:$16 sps:$4 sm:$0xff]   ;;  %v3823_v7 = vld [vmem:[#allocation4 + $0x240] ss:$16 sps:$4 sm:$0xff]  }
 0x16b   :  { %2199 = vmatprep.subr.bf16.mxu0 %v3759_v8  ;;  %2281 = vmatprep.subr.bf16.mxu1 %v3762_v9  ;;  %v3826_v8 = vld [vmem:[#allocation4 + $0x248] ss:$16 sps:$4 sm:$0xff]   ;;  %v3831_v9 = vld [vmem:[#allocation4 + $0x264] ss:$16 sps:$4 sm:$0xff]  }
 0x16e   :  { %2200 = vmatpush1.bf16.msra.mxu0 %v3757_v10  ;;  %2282 = vmatpush1.bf16.msra.mxu1 %v3760_v11  ;;  %v3834_v10 = vld [vmem:[#allocation4 + $0x26c] ss:$16 sps:$4 sm:$0xff]   ;;  %v3829_v11 = vld [vmem:[#allocation4 + $0x260] ss:$16 sps:$4 sm:$0xff]  }
 0x16f   :  { %2201 = vmatprep.subr.bf16.mxu0 %v3765_v13  ;;  %2283 = vmatprep.subr.bf16.mxu1 %v3768_v14  ;;  %v3832_v13 = vld [vmem:[#allocation4 + $0x268] ss:$16 sps:$4 sm:$0xff]   ;;  %v3837_v14 = vld [vmem:[#allocation4 + $0x284] ss:$16 sps:$4 sm:$0xff]  }
 0x172   :  { %2202 = vmatpush1.bf16.msra.mxu0 %v3763_v15  ;;  %2284 = vmatpush1.bf16.msra.mxu1 %v3766_v16  ;;  %v3840_v15 = vld [vmem:[#allocation4 + $0x28c] ss:$16 sps:$4 sm:$0xff]   ;;  %v3835_v16 = vld [vmem:[#allocation4 + $0x280] ss:$16 sps:$4 sm:$0xff]  }
 0x173   :  { %2203 = vmatprep.subr.bf16.mxu0 %v3771_v17  ;;  %2285 = vmatprep.subr.bf16.mxu1 %v3774_v18  ;;  %v3838_v17 = vld [vmem:[#allocation4 + $0x288] ss:$16 sps:$4 sm:$0xff]   ;;  %v3843_v18 = vld [vmem:[#allocation4 + $0x2a4] ss:$16 sps:$4 sm:$0xff]  }
 0x176   :  { %2204 = vmatpush1.bf16.msra.mxu0 %v3769_v19  ;;  %2286 = vmatpush1.bf16.msra.mxu1 %v3772_v20  ;;  %v3846_v19 = vld [vmem:[#allocation4 + $0x2ac] ss:$16 sps:$4 sm:$0xff]   ;;  %v3841_v20 = vld [vmem:[#allocation4 + $0x2a0] ss:$16 sps:$4 sm:$0xff]  }
 0x177   :  { %2205 = vmatprep.subr.bf16.mxu0 %v3777_v21  ;;  %2287 = vmatprep.subr.bf16.mxu1 %v3780_v24  ;;  %v3844_v21 = vld [vmem:[#allocation4 + $0x2a8] ss:$16 sps:$4 sm:$0xff]   ;;  %v3849_v24 = vld [vmem:[#allocation4 + $0x2c4] ss:$16 sps:$4 sm:$0xff]  }
 0x17a   :  { %2206 = vmatpush1.bf16.msra.mxu0 %v3775_v25  ;;  %2288 = vmatpush1.bf16.msra.mxu1 %v3778_v26  ;;  %v3852_v25 = vld [vmem:[#allocation4 + $0x2cc] ss:$16 sps:$4 sm:$0xff]   ;;  %v3847_v26 = vld [vmem:[#allocation4 + $0x2c0] ss:$16 sps:$4 sm:$0xff]  }
 0x17b   :  { %2207 = vmatprep.subr.bf16.mxu0 %v3783_v27  ;;  %2289 = vmatprep.subr.bf16.mxu1 %v3786_v28  ;;  %v3850_v27 = vld [vmem:[#allocation4 + $0x2c8] ss:$16 sps:$4 sm:$0xff]   ;;  %v3855_v28 = vld [vmem:[#allocation4 + $0x2e4] ss:$16 sps:$4 sm:$0xff]  }
 0x17e   :  { %2208 = vmatpush1.bf16.msra.mxu0 %v3781_v29  ;;  %2290 = vmatpush1.bf16.msra.mxu1 %v3784_v30  ;;  %v3858_v29 = vld [vmem:[#allocation4 + $0x2ec] ss:$16 sps:$4 sm:$0xff]   ;;  %v3853_v30 = vld [vmem:[#allocation4 + $0x2e0] ss:$16 sps:$4 sm:$0xff]  }
 0x17f   :  { %2209 = vmatprep.subr.bf16.mxu0 %v3789_v31  ;;  %2291 = vmatprep.subr.bf16.mxu1 %v3792_v32  ;;  %v3856_v31 = vld [vmem:[#allocation4 + $0x2e8] ss:$16 sps:$4 sm:$0xff]   ;;  %v3861_v32 = vld [vmem:[#allocation4 + $0x304] ss:$16 sps:$4 sm:$0xff]  }
 0x182   :  { %2210 = vmatpush1.bf16.msra.mxu0 %v3787_v34  ;;  %2292 = vmatpush1.bf16.msra.mxu1 %v3790_v35  ;;  %v3859_v34 = vld [vmem:[#allocation4 + $0x300] ss:$16 sps:$4 sm:$0xff]   ;;  %v3862_v35 = vld [vmem:[#allocation4 + $0x308] ss:$16 sps:$4 sm:$0xff]  }
 0x183   :  { %2211 = vmatprep.subr.bf16.mxu0 %v3795_v36  ;;  %2293 = vmatprep.subr.bf16.mxu1 %v3798_v2  ;;  %v3867_v36 = vld [vmem:[#allocation4 + $0x324] ss:$16 sps:$4 sm:$0xff]   ;;  %v3870_v2 = vld [vmem:[#allocation4 + $0x32c] ss:$16 sps:$4 sm:$0xff]  }
 0x186   :  { %2212 = vmatpush1.bf16.msra.mxu0 %v3793_v39  ;;  %2294 = vmatpush1.bf16.msra.mxu1 %v3796_v41  ;;  %v3873_v39 = vld [vmem:[#allocation4 + $0x344] ss:$16 sps:$4 sm:$0xff]   ;;  %v3876_v41 = vld [vmem:[#allocation4 + $0x34c] ss:$16 sps:$4 sm:$0xff]  }
 0x187   :  { %2213 = vmatprep.subr.bf16.mxu0 %v3801_v42  ;;  %2295 = vmatprep.subr.bf16.mxu1 %v3804_v23  ;;  %v3871_v42 = vld [vmem:[#allocation4 + $0x340] ss:$16 sps:$4 sm:$0xff]   ;;  %v3874_v23 = vld [vmem:[#allocation4 + $0x348] ss:$16 sps:$4 sm:$0xff]  }
 0x18a   :  { %2214 = vmatpush1.bf16.msra.mxu0 %v3799_v46  ;;  %2296 = vmatpush1.bf16.msra.mxu1 %v3802_v47  ;;  %v3877_v46 = vld [vmem:[#allocation4 + $0x360] ss:$16 sps:$4 sm:$0xff]   ;;  %v3880_v47 = vld [vmem:[#allocation4 + $0x368] ss:$16 sps:$4 sm:$0xff]  }
 0x18b   :  { %2215 = vmatprep.subr.bf16.mxu0 %v3807_v48  ;;  %2297 = vmatprep.subr.bf16.mxu1 %v3810_v49  ;;  %v3885_v48 = vld [vmem:[#allocation4 + $0x384] ss:$16 sps:$4 sm:$0xff]   ;;  %v3888_v49 = vld [vmem:[#allocation4 + $0x38c] ss:$16 sps:$4 sm:$0xff]  }
 0x18e   :  { %2216 = vmatpush1.bf16.msra.mxu0 %v3805_v52  ;;  %2298 = vmatpush1.bf16.msra.mxu1 %v3808_v58  ;;  %v110_v52 = vsub.s32 6, %v4177_v53  ;;  %v3891_v58 = vld [vmem:[#allocation4 + $0x3a4] ss:$16 sps:$4 sm:$0xff]  }
 0x18f   :  { %2226 = vmatprep.subr.bf16.mxu0 %v3813_v59  ;;  %2308 = vmatprep.subr.bf16.mxu1 %v3816_v60  ;;  %v3894_v59 = vld [vmem:[#allocation4 + $0x3ac] ss:$16 sps:$4 sm:$0xff]   ;;  %v3889_v60 = vld [vmem:[#allocation4 + $0x3a0] ss:$16 sps:$4 sm:$0xff]  }
 0x191   :  { %2218 = vmatmul.mubr.bf16.vlgmr.msra.gmra.mrb[12].mxu0 %v429_v61  ;;  %2300 = vmatmul.mubr.bf16.vlgmr.msra.gmra.mrb[12].mxu1 %v429_v61  ;;  %v111_v61 = vrot.slane %v4185_v55, %v110_v52  ;;  %v3907_v55 = vld [vmem:[%s4458_s7 + $0x140] sm:$0xff]  }
 0x192   :  { %2227 = vmatpush1.bf16.msra.mxu0 %v3811_v62  ;;  %2309 = vmatpush1.bf16.msra.mxu1 %v3814_v63  ;;  %v3897_v62 = vld [vmem:[#allocation4 + $0x3c4] ss:$16 sps:$4 sm:$0xff]   ;;  %v3900_v63 = vld [vmem:[#allocation4 + $0x3cc] ss:$16 sps:$4 sm:$0xff]   ;;  %v1523_v52 = vld [vmem:[%s4457_s6] sm:$0xf] }
 0x193   :  { %2228 = vmatprep.subr.bf16.mxu0 %v3819_v0  ;;  %2310 = vmatprep.subr.bf16.mxu1 %v3822_v1  ;;  %v3895_v0 = vld [vmem:[#allocation4 + $0x3c0] ss:$16 sps:$4 sm:$0xff]   ;;  %v3898_v1 = vld [vmem:[#allocation4 + $0x3c8] ss:$16 sps:$4 sm:$0xff]   ;;  %v411_v53 = vadd.f32 %v4205_v40, %v111_v61  ;;  %v1532_v61 = vrot.slane %v1523_v52, %v4188_v56 }
 0x194   :  { %2258 = vmatprep.mubr.bf16.mxu0 %v432_v43  ;;  %2340 = vmatprep.mubr.bf16.mxu1 %v432_v43  ;;  %v3903_v43 = vld [vmem:[#allocation4 + $0x3e4] ss:$16 sps:$4 sm:$0xff]  }
 0x195   :  { %v3909_v40 = vld [vmem:[%s4458_s7 + $0x100] sm:$0xff]  }
 0x196   :  { %2229 = vmatpush1.bf16.msra.mxu0 %v3817_v3  ;;  %2311 = vmatpush1.bf16.msra.mxu1 %v3820_v4  ;;  %v3906_v3 = vld [vmem:[#allocation4 + $0x3ec] ss:$16 sps:$4 sm:$0xff]   ;;  %v3901_v4 = vld [vmem:[#allocation4 + $0x3e0] ss:$16 sps:$4 sm:$0xff]  }
 0x197   :  { %2230 = vmatprep.subr.bf16.mxu0 %v3825_v5  ;;  %2312 = vmatprep.subr.bf16.mxu1 %v3828_v6  ;;  %v3904_v5 = vld [vmem:[#allocation4 + $0x3e8] ss:$16 sps:$4 sm:$0xff]   ;;  %v423_v6 = vmax.f32 %v411_v53, 0.0 }
 0x19a   :  { %2231 = vmatpush1.bf16.msra.mxu0 %v3823_v7  ;;  %2313 = vmatpush1.bf16.msra.mxu1 %v3826_v8  ;;  %v3908_v7 = vld [vmem:[%s4458_s7 + $0x1c0] sm:$0xff]  }
 0x19b   :  { %2232 = vmatprep.subr.bf16.mxu0 %v3831_v9  ;;  %2314 = vmatprep.subr.bf16.mxu1 %v3834_v10  ;;  %v3910_v8 = vld [vmem:[%s4458_s7 + $0x180] sm:$0xff]   ;;  %v431_v9 = vpack.c.bf16 %v423_v6, %v423_v6  ;;  %v3911_v10 = vld [vmem:[%s4458_s7 + $0x148] sm:$0xff]  }
 0x19e   :  { %2233 = vmatpush1.bf16.msra.mxu0 %v3829_v11  ;;  %2315 = vmatpush1.bf16.msra.mxu1 %v3832_v13  ;;  %v3912_v11 = vld [vmem:[%s4458_s7 + $0x1c8] sm:$0xff]  }
 0x19f   :  { %2234 = vmatprep.subr.bf16.mxu0 %v3837_v14  ;;  %2316 = vmatprep.subr.bf16.mxu1 %v3840_v15  ;;  %v3913_v13 = vld [vmem:[%s4458_s7 + $0x108] sm:$0xff]   ;;  %v3915_v15 = vld [vmem:[%s4458_s7 + $0x150] sm:$0xff]  }
 0x1a0   :  { %v3914_v14 = vld [vmem:[%s4458_s7 + $0x188] sm:$0xff]  }
 0x1a2   :  { %2235 = vmatpush1.bf16.msra.mxu0 %v3835_v16  ;;  %2317 = vmatpush1.bf16.msra.mxu1 %v3838_v17  ;;  %v3916_v16 = vld [vmem:[%s4458_s7 + $0x1d0] sm:$0xff]  }
 0x1a3   :  { %2236 = vmatprep.subr.bf16.mxu0 %v3843_v18  ;;  %2318 = vmatprep.subr.bf16.mxu1 %v3846_v19  ;;  %v3917_v17 = vld [vmem:[%s4458_s7 + $0x110] sm:$0xff]   ;;  %v3919_v19 = vld [vmem:[%s4458_s7 + $0x158] sm:$0xff]  }
 0x1a4   :  { %v3918_v18 = vld [vmem:[%s4458_s7 + $0x190] sm:$0xff]  }
 0x1a6   :  { %2237 = vmatpush1.bf16.msra.mxu0 %v3841_v20  ;;  %2319 = vmatpush1.bf16.msra.mxu1 %v3844_v21  ;;  %v3920_v20 = vld [vmem:[%s4458_s7 + $0x1d8] sm:$0xff]  }
 0x1a7   :  { %2238 = vmatprep.subr.bf16.mxu0 %v3849_v24  ;;  %2320 = vmatprep.subr.bf16.mxu1 %v3852_v25  ;;  %v3921_v21 = vld [vmem:[%s4458_s7 + $0x118] sm:$0xff]   ;;  %v3923_v25 = vld [vmem:[%s4458_s7 + $0x160] sm:$0xff]  }
 0x1a8   :  { %v3922_v24 = vld [vmem:[%s4458_s7 + $0x198] sm:$0xff]  }
 0x1aa   :  { %2239 = vmatpush1.bf16.msra.mxu0 %v3847_v26  ;;  %2321 = vmatpush1.bf16.msra.mxu1 %v3850_v27  ;;  %v3924_v26 = vld [vmem:[%s4458_s7 + $0x1e0] sm:$0xff]  }
 0x1ab   :  { %2240 = vmatprep.subr.bf16.mxu0 %v3855_v28  ;;  %2322 = vmatprep.subr.bf16.mxu1 %v3858_v29  ;;  %v3925_v27 = vld [vmem:[%s4458_s7 + $0x120] sm:$0xff]   ;;  %v3927_v29 = vld [vmem:[%s4458_s7 + $0x168] sm:$0xff]  }
 0x1ac   :  { %v3926_v28 = vld [vmem:[%s4458_s7 + $0x1a0] sm:$0xff]  }
 0x1ae   :  { %2241 = vmatpush1.bf16.msra.mxu0 %v3853_v30  ;;  %2323 = vmatpush1.bf16.msra.mxu1 %v3856_v31  ;;  %v3928_v30 = vld [vmem:[%s4458_s7 + $0x1e8] sm:$0xff]  }
 0x1af   :  { %2242 = vmatprep.subr.bf16.mxu0 %v3861_v32  ;;  %2324 = vmatprep.subr.bf16.mxu1 %v3864_v33  ;;  %v3929_v31 = vld [vmem:[%s4458_s7 + $0x128] sm:$0xff]   ;;  %v3931_v33 = vld [vmem:[%s4458_s7 + $0x170] sm:$0xff]  }
 0x1b0   :  { %v3930_v32 = vld [vmem:[%s4458_s7 + $0x1a8] sm:$0xff]  }
 0x1b2   :  { %2243 = vmatpush1.bf16.msra.mxu0 %v3859_v34  ;;  %2325 = vmatpush1.bf16.msra.mxu1 %v3862_v35  ;;  %v3932_v34 = vld [vmem:[%s4458_s7 + $0x1f0] sm:$0xff]  }
 0x1b3   :  { %2244 = vmatprep.subr.bf16.mxu0 %v3867_v36  ;;  %2326 = vmatprep.subr.bf16.mxu1 %v3870_v2  ;;  %v3933_v35 = vld [vmem:[%s4458_s7 + $0x130] sm:$0xff]  }
 0x1b4   :  { %v3934_v36 = vld [vmem:[%s4458_s7 + $0x1b0] sm:$0xff]  }
 0x1b6   :  { %2245 = vmatpush1.bf16.msra.mxu0 %v3865_v37  ;;  %2327 = vmatpush1.bf16.msra.mxu1 %v3868_v38 }
 0x1b7   :  { %2246 = vmatprep.subr.bf16.mxu0 %v3873_v39  ;;  %2328 = vmatprep.subr.bf16.mxu1 %v3876_v41 }
 0x1ba   :  { %2247 = vmatpush1.bf16.msra.mxu0 %v3871_v42  ;;  %2329 = vmatpush1.bf16.msra.mxu1 %v3874_v23  ;;  %v3935_v23 = vld [vmem:[%s4458_s7 + $0x178] sm:$0xff]  }
 0x1bb   :  { %2248 = vmatprep.subr.bf16.mxu0 %v3879_v44  ;;  %2330 = vmatprep.subr.bf16.mxu1 %v3882_v45  ;;  %v3936_v44 = vld [vmem:[%s4458_s7 + $0x1f8] sm:$0xff]  }
 0x1be   :  { %2249 = vmatpush1.bf16.msra.mxu0 %v3877_v46  ;;  %2331 = vmatpush1.bf16.msra.mxu1 %v3880_v47  ;;  %v3937_v47 = vld [vmem:[%s4458_s7 + $0x138] sm:$0xff]  }
 0x1bf   :  { %2250 = vmatprep.subr.bf16.mxu0 %v3885_v48  ;;  %2332 = vmatprep.subr.bf16.mxu1 %v3888_v49  ;;  %v3938_v48 = vld [vmem:[%s4458_s7 + $0x1b8] sm:$0xff]   ;;  %v3939_v49 = vld [vmem:[%s4458_s7 + $0x40] sm:$0xff]  }
 0x1c2   :  { %2251 = vmatpush1.bf16.msra.mxu0 %v3883_v50  ;;  %2333 = vmatpush1.bf16.msra.mxu1 %v3886_v51  ;;  %v3940_v50 = vld [vmem:[%s4458_s7 + $0xc0] sm:$0xff]  }
 0x1c3   :  { %2252 = vmatprep.subr.bf16.mxu0 %v3891_v58  ;;  %2334 = vmatprep.subr.bf16.mxu1 %v3894_v59  ;;  %v4336_v51 = vld [vmem:[%s4455_s4] sm:$0xf] }
 0x1c4   :  { %v570_v58 = vrot.slane %v4336_v51, %v4188_v56  ;;  %v578_v59 = vrot.slane %v4336_v51, %v4191_v57 }
 0x1c6   :  { %2253 = vmatpush1.bf16.msra.mxu0 %v3889_v60  ;;  %2335 = vmatpush1.bf16.msra.mxu1 %v3892_v22  ;;  %v1528_v60 = vrot.slane %v1523_v52, %v4180_v54  ;;  %v1536_v22 = vrot.slane %v1523_v52, %v4210_v12 }
 0x1c7   :  { %2254 = vmatprep.subr.bf16.mxu0 %v3897_v62  ;;  %2336 = vmatprep.subr.bf16.mxu1 %v3900_v63  ;;  %v1540_v62 = vrot.slane %v1523_v52, %v4191_v57  ;;  %v3965_v52 = vld [vmem:[%s4458_s7 + $0x30] sm:$0xff]  }
 0x1ca   :  { %2255 = vmatpush1.bf16.msra.mxu0 %v3895_v0  ;;  %2337 = vmatpush1.bf16.msra.mxu1 %v3898_v1 }
 0x1cb   :  { %2256 = vmatprep.subr.bf16.mxu0 %v3903_v43  ;;  %2338 = vmatprep.subr.bf16.mxu1 %v3906_v3 }
 0x1ce   :  { %2257 = vmatpush1.bf16.msra.mxu0 %v3901_v4  ;;  %2339 = vmatpush1.bf16.msra.mxu1 %v3904_v5 }
 0x1cf   :  { %3398 = vmatprep.subr.bf16.mxu0 %v3907_v55  ;;  %3420 = vmatprep.subr.bf16.mxu1 %v3908_v7 }
 0x1d1   :  { %2259 = vmatmul.mubr.bf16.vlgmr.msra.gmra.mrb[12].mxu0 %v431_v9  ;;  %2341 = vmatmul.mubr.bf16.vlgmr.msra.gmra.mrb[12].mxu1 %v431_v9 }
 0x1d2   :  { %3399 = vmatpush3.bf16.msra.mxu0 %v3909_v40  ;;  %3421 = vmatpush3.bf16.msra.mxu1 %v3910_v8 }
 0x1d3   :  { %3400 = vmatprep.subr.bf16.mxu0 %v3911_v10  ;;  %3422 = vmatprep.subr.bf16.mxu1 %v3912_v11 }
 0x1d6   :  { %3401 = vmatpush3.bf16.msra.mxu0 %v3913_v13  ;;  %3423 = vmatpush3.bf16.msra.mxu1 %v3914_v14 }
 0x1d7   :  { %3402 = vmatprep.subr.bf16.mxu0 %v3915_v15  ;;  %3424 = vmatprep.subr.bf16.mxu1 %v3916_v16 }
 0x1da   :  { %3403 = vmatpush3.bf16.msra.mxu0 %v3917_v17  ;;  %3425 = vmatpush3.bf16.msra.mxu1 %v3918_v18  ;;  %v3941_v17 = vld [vmem:[%s4458_s7] sm:$0xff]  }
 0x1db   :  { %3404 = vmatprep.subr.bf16.mxu0 %v3919_v19  ;;  %3426 = vmatprep.subr.bf16.mxu1 %v3920_v20  ;;  %v3942_v18 = vld [vmem:[%s4458_s7 + $0x80] sm:$0xff]  }
 0x1de   :  { %3405 = vmatpush3.bf16.msra.mxu0 %v3921_v21  ;;  %3427 = vmatpush3.bf16.msra.mxu1 %v3922_v24  ;;  %v3943_v21 = vld [vmem:[%s4458_s7 + $0x48] sm:$0xff]  }
 0x1df   :  { %3406 = vmatprep.subr.bf16.mxu0 %v3923_v25  ;;  %3428 = vmatprep.subr.bf16.mxu1 %v3924_v26  ;;  %v3944_v24 = vld [vmem:[%s4458_s7 + $0xc8] sm:$0xff]  }
 0x1e2   :  { %3407 = vmatpush3.bf16.msra.mxu0 %v3925_v27  ;;  %3429 = vmatpush3.bf16.msra.mxu1 %v3926_v28  ;;  %v3945_v27 = vld [vmem:[%s4458_s7 + $0x8] sm:$0xff]  }
 0x1e3   :  { %3408 = vmatprep.subr.bf16.mxu0 %v3927_v29  ;;  %3430 = vmatprep.subr.bf16.mxu1 %v3928_v30  ;;  %v3946_v28 = vld [vmem:[%s4458_s7 + $0x88] sm:$0xff]   ;;  %v3947_v29 = vld [vmem:[%s4458_s7 + $0x50] sm:$0xff]  }
 0x1e4   :  { %v3948_v30 = vld [vmem:[%s4458_s7 + $0xd0] sm:$0xff]  }
 0x1e6   :  { %3409 = vmatpush3.bf16.msra.mxu0 %v3929_v31  ;;  %3431 = vmatpush3.bf16.msra.mxu1 %v3930_v32  ;;  %v3949_v31 = vld [vmem:[%s4458_s7 + $0x10] sm:$0xff]  }
 0x1e7   :  { %3410 = vmatprep.subr.bf16.mxu0 %v3931_v33  ;;  %3432 = vmatprep.subr.bf16.mxu1 %v3932_v34  ;;  %v3950_v32 = vld [vmem:[%s4458_s7 + $0x90] sm:$0xff]   ;;  %v3951_v33 = vld [vmem:[%s4458_s7 + $0x58] sm:$0xff]  }
 0x1e8   :  { %v3952_v34 = vld [vmem:[%s4458_s7 + $0xd8] sm:$0xff]  }
 0x1ea   :  { %3411 = vmatpush3.bf16.msra.mxu0 %v3933_v35  ;;  %3433 = vmatpush3.bf16.msra.mxu1 %v3934_v36  ;;  %v3953_v35 = vld [vmem:[%s4458_s7 + $0x18] sm:$0xff]  }
 0x1eb   :  { %3412 = vmatprep.subr.bf16.mxu0 %v3935_v23  ;;  %3434 = vmatprep.subr.bf16.mxu1 %v3936_v44  ;;  %v3954_v36 = vld [vmem:[%s4458_s7 + $0x98] sm:$0xff]   ;;  %v3959_v23 = vld [vmem:[%s4458_s7 + $0x68] sm:$0xff]  }
 0x1ec   :  { %v3960_v44 = vld [vmem:[%s4458_s7 + $0xe8] sm:$0xff]  }
 0x1ee   :  { %3413 = vmatpush3.bf16.msra.mxu0 %v3937_v47  ;;  %3435 = vmatpush3.bf16.msra.mxu1 %v3938_v48  ;;  %v566_v47 = vrot.slane %v4336_v51, %v4180_v54  ;;  %v574_v48 = vrot.slane %v4336_v51, %v4210_v12  ;;  %v3966_v54 = vld [vmem:[%s4458_s7 + $0xb0] sm:$0xff]  }
 0x1ef   :  { %3442 = vmatprep.subr.bf16.mxu0 %v3939_v49  ;;  %3464 = vmatprep.subr.bf16.mxu1 %v3940_v50  ;;  %v3963_v49 = vld [vmem:[%s4458_s7 + $0x70] sm:$0xff]  }
 0x1f0   :  { %v3964_v50 = vld [vmem:[%s4458_s7 + $0xf0] sm:$0xff]  }
 0x224   :  { %v4311_v2 = vpop.f32.mrb[8].mxu0  ;;  %v4313_v37 = vpop.f32.mrb[8].mxu1 }
 0x225   :  { %v1300_v38 = vpop.f32.mrb[9].mxu0  ;;  %v1382_v39 = vpop.f32.mrb[9].mxu1  ;;  %v3486_v12 = vadd.f32 %v4311_v2, %v566_v47  ;;  %v3488_v51 = vadd.f32 %v4313_v37, %v574_v48  ;;  %v3970_v2 = vld [vmem:[%s4458_s7 + $0xb8] sm:$0xff]  }
 0x226   :  { %v1302_v41 = vpop.f32.mrb[10].mxu0  ;;  %v1384_v42 = vpop.f32.mrb[10].mxu1  ;;  %v3487_v1 = vadd.f32 %v1300_v38, %v570_v58  ;;  %v3489_v53 = vadd.f32 %v1382_v39, %v578_v59  ;;  %v3955_v38 = vld [vmem:[%s4458_s7 + $0x60] sm:$0xff]   ;;  %v3967_v58 = vld [vmem:[%s4458_s7 + $0x78] sm:$0xff]  }
 0x227   :  { %v1303_v45 = vpop.f32.mrb[11].mxu0  ;;  %v1385_v46 = vpop.f32.mrb[11].mxu1  ;;  %v3956_v39 = vld [vmem:[%s4458_s7 + $0xe0] sm:$0xff]   ;;  %v3968_v59 = vld [vmem:[%s4458_s7 + $0xf8] sm:$0xff]   ;;  %v1387_v37 = vmax.f32 %v3486_v12, 0.0 }
 0x228   :  { %v1388_v14 = vmax.f32 %v3487_v1, 0.0  ;;  %v1390_v57 = vmax.f32 %v3489_v53, 0.0  ;;  %v3957_v41 = vld [vmem:[%s4458_s7 + $0x20] sm:$0xff]   ;;  %v3961_v45 = vld [vmem:[%s4458_s7 + $0x28] sm:$0xff]  }
 0x229   :  { %v3958_v42 = vld [vmem:[%s4458_s7 + $0xa0] sm:$0xff]   ;;  %v3962_v46 = vld [vmem:[%s4458_s7 + $0xa8] sm:$0xff]  }
 0x22a   :  { %v1392_v25 = vpack.c.bf16 %v1388_v14, %v1388_v14  ;;  %v1394_v26 = vpack.c.bf16 %v1390_v57, %v1390_v57 }
 0x2a4   :  { %v2260_v63 = vpop.f32.mrb[12].mxu0  ;;  %v2342_v0 = vpop.f32.mrb[12].mxu1 }
 0x2a5   :  { %v3490_v43 = vadd.f32 %v2260_v63, %v1528_v60  ;;  %v3492_v3 = vadd.f32 %v2342_v0, %v1536_v22  ;;  %v2262_v4 = vpop.f32.mrb[13].mxu0  ;;  %v2344_v5 = vpop.f32.mrb[13].mxu1  ;;  %v3969_v60 = vld [vmem:[%s4458_s7 + $0x38] sm:$0xff]   ;;  %v1389_v22 = vmax.f32 %v3488_v51, 0.0 }
 0x2a6   :  { %v3491_v6 = vadd.f32 %v2262_v4, %v1532_v61  ;;  %v3493_v55 = vadd.f32 %v2344_v5, %v1540_v62  ;;  %v2264_v7 = vpop.f32.mrb[14].mxu0  ;;  %v2346_v40 = vpop.f32.mrb[14].mxu1  ;;  %v1391_v61 = vpack.c.bf16 %v1387_v37, %v1387_v37 }
 0x2a7   :  { %v2349_v8 = vmax.f32 %v3490_v43, 0.0  ;;  %v2351_v9 = vmax.f32 %v3492_v3, 0.0  ;;  %v2265_v10 = vpop.f32.mrb[15].mxu0  ;;  %v2347_v11 = vpop.f32.mrb[15].mxu1  ;;  %v1393_v62 = vpack.c.bf16 %v1389_v22, %v1389_v22 }
 0x2a8   :  { %v2350_v13 = vmax.f32 %v3491_v6, 0.0  ;;  %v2352_v56 = vmax.f32 %v3493_v55, 0.0 }
 0x2a9   :  { %v2353_v19 = vpack.c.bf16 %v2349_v8, %v2349_v8  ;;  %v2355_v20 = vpack.c.bf16 %v2351_v9, %v2351_v9 }
 0x2aa   :  { %v2354_v15 = vpack.c.bf16 %v2350_v13, %v2350_v13  ;;  %v2356_v16 = vpack.c.bf16 %v2352_v56, %v2352_v56 }
 0x2ac   :  { %2709 = vmatprep.mubr.bf16.mxu0 %v2354_v15  ;;  %2749 = vmatprep.mubr.bf16.mxu1 %v2356_v16 }
 0x2ad   :  { %2710 = vmatmul.mubr.bf16.vlgmr.msra.gmra.mrb[16].mxu0 %v2353_v19  ;;  %2750 = vmatmul.mubr.bf16.vlgmr.msra.gmra.mrb[16].mxu1 %v2355_v20 }
 0x2ae   :  { %3443 = vmatpush3.bf16.msra.mxu0 %v3941_v17  ;;  %3465 = vmatpush3.bf16.msra.mxu1 %v3942_v18  ;;  %v3397_v17 = vld [vmem:[%s4459_s8] ss:$0 sm:$0xff] }
 0x2af   :  { %2981 = vmatprep.mubr.bf16.mxu0 %v1392_v25  ;;  %3021 = vmatprep.mubr.bf16.mxu1 %v1394_v26 }
 0x2b0   :  { %3444 = vmatprep.subr.bf16.mxu0 %v3943_v21  ;;  %3466 = vmatprep.subr.bf16.mxu1 %v3944_v24 }
 0x2b2   :  { %3445 = vmatpush3.bf16.msra.mxu0 %v3945_v27  ;;  %3467 = vmatpush3.bf16.msra.mxu1 %v3946_v28 }
 0x2b3   :  { %3446 = vmatprep.subr.bf16.mxu0 %v3947_v29  ;;  %3468 = vmatprep.subr.bf16.mxu1 %v3948_v30 }
 0x2b6   :  { %3447 = vmatpush3.bf16.msra.mxu0 %v3949_v31  ;;  %3469 = vmatpush3.bf16.msra.mxu1 %v3950_v32 }
 0x2b7   :  { %3448 = vmatprep.subr.bf16.mxu0 %v3951_v33  ;;  %3470 = vmatprep.subr.bf16.mxu1 %v3952_v34 }
 0x2ba   :  { %3449 = vmatpush3.bf16.msra.mxu0 %v3953_v35  ;;  %3471 = vmatpush3.bf16.msra.mxu1 %v3954_v36 }
 0x2bb   :  { %3450 = vmatprep.subr.bf16.mxu0 %v3955_v38  ;;  %3472 = vmatprep.subr.bf16.mxu1 %v3956_v39 }
 0x2be   :  { %3451 = vmatpush3.bf16.msra.mxu0 %v3957_v41  ;;  %3473 = vmatpush3.bf16.msra.mxu1 %v3958_v42 }
 0x2bf   :  { %3452 = vmatprep.subr.bf16.mxu0 %v3959_v23  ;;  %3474 = vmatprep.subr.bf16.mxu1 %v3960_v44 }
 0x2c2   :  { %3453 = vmatpush3.bf16.msra.mxu0 %v3961_v45  ;;  %3475 = vmatpush3.bf16.msra.mxu1 %v3962_v46 }
 0x2c3   :  { %3454 = vmatprep.subr.bf16.mxu0 %v3963_v49  ;;  %3476 = vmatprep.subr.bf16.mxu1 %v3964_v50 }
 0x2c6   :  { %3455 = vmatpush3.bf16.msra.mxu0 %v3965_v52  ;;  %3477 = vmatpush3.bf16.msra.mxu1 %v3966_v54 }
 0x2c7   :  { %3456 = vmatprep.subr.bf16.mxu0 %v3967_v58  ;;  %3478 = vmatprep.subr.bf16.mxu1 %v3968_v59 }
 0x2ca   :  { %3457 = vmatpush3.bf16.msra.mxu0 %v3969_v60  ;;  %3479 = vmatpush3.bf16.msra.mxu1 %v3970_v2 }
 0x2cd   :  { %2982 = vmatmul.mubr.bf16.vlgmr.msra.gmra.mrb[20].mxu0 %v1391_v61  ;;  %3022 = vmatmul.mubr.bf16.vlgmr.msra.gmra.mrb[20].mxu1 %v1393_v62 }
 0x380   :  { %v3414_v63 = vpop.f32.mrb[16].mxu0  ;;  %v3436_v0 = vpop.f32.mrb[16].mxu1 }
 0x381   :  { %v3415_v1 = vpop.f32.mrb[17].mxu0  ;;  %v3437_v53 = vpop.f32.mrb[17].mxu1 }
 0x382   :  { %v3416_v43 = vadd.f32 %v3415_v1, %v3414_v63  ;;  %v3438_v3 = vadd.f32 %v3437_v53, %v3436_v0  ;;  %v3417_v4 = vpop.f32.mrb[18].mxu0  ;;  %v3439_v5 = vpop.f32.mrb[18].mxu1 }
 0x383   :  { %v3418_v6 = vpop.f32.mrb[19].mxu0  ;;  %v3440_v55 = vpop.f32.mrb[19].mxu1 }
 0x384   :  { %v2752_v7 = vadd.f32 %v3438_v3, %v3416_v43 }
 0x3a0   :  { %v3458_v40 = vpop.f32.mrb[20].mxu0  ;;  %v3480_v8 = vpop.f32.mrb[20].mxu1 }
 0x3a1   :  { %v3459_v9 = vpop.f32.mrb[21].mxu0  ;;  %v3481_v10 = vpop.f32.mrb[21].mxu1 }
 0x3a2   :  { %v3460_v11 = vadd.f32 %v3459_v9, %v3458_v40  ;;  %v3482_v13 = vadd.f32 %v3481_v10, %v3480_v8  ;;  %v3461_v56 = vpop.f32.mrb[22].mxu0  ;;  %v3483_v14 = vpop.f32.mrb[22].mxu1 }
 0x3a3   :  { %v3462_v57 = vpop.f32.mrb[23].mxu0  ;;  %v3484_v15 = vpop.f32.mrb[23].mxu1 }
 0x3a4   :  { %v2984_v16 = vadd.f32 %v3460_v11, %v2752_v7 }
 0x3a6   :  { %v3024_v18 = vadd.f32 %v3482_v13, %v2984_v16 }
 0x3a8   :  { %v3036_v19 = vadd.f32 %v3397_v17, %v3024_v18 }
 0x3aa   :  { %3038 = vst.msk [vmem:[%s4460_s9] sm:$0xff] %vm3037_vm2, %v3036_v19 }
 0x3ab   :  { %3043 = vsyncpa [#allocation3], 1 }
 0x3ac   :  { %3044 = vsyncpa [#allocation5], 1 }

</bundles_post_ra>
